<compile_context>
chip_gen: v6e
topology: v6e:2x2x1
jax: 0.10.0
libtpu: 0.0.40
codegen_flags: <defaults>
</compile_context>

<pallas_src>
import functools

import jax
import jax.numpy as jnp
from jax import lax
from jax.experimental import pallas as pl
from jax.experimental.pallas import tpu as pltpu


def _gelu_tanh(x):
    # tanh approximation of GELU (used by both kernel and reference).
    # TODO(synk): PyTorch F.gelu default is the exact erf form; the tanh approximation
    # differs by <~1e-3 and is used here because tanh lowers cleanly on the TPU EUP.
    c = 0.7978845608028654  # sqrt(2/pi)
    return 0.5 * x * (1.0 + jnp.tanh(c * (x + 0.044715 * (x * x * x))))


def _action_head_kernel(x_ref, wks_ref, bks_ref, wv_ref, bv_ref, wo_ref, bo_ref,
                        ln_g_ref, ln_b_ref, w1_ref, b1_ref, w2_ref, b2_ref,
                        wp_ref, bp_ref, o_ref, *, ln_eps):
    """Fused MAPHead (single readout) + projection for one batch tile."""
    f32 = jnp.float32
    bb, seq_len, d_model = x_ref.shape
    mm_dtype = wv_ref.dtype  # matmul operand dtype (bf16 or f32), accumulation is f32

    # NOTE: merging (bb, L) -> bb*L is layout-free only when L is a multiple of the
    # sublane pack (8 for f32, 16 for bf16); otherwise Mosaic inserts a relayout copy.
    x = x_ref[...].reshape(bb * seq_len, d_model)                     # (N, D)

    # Attention scores.  The probe query, the per-head structure and 1/sqrt(dh) are
    # folded into (Wk_s, bk_s) in the wrapper, so one matmul yields each key's score
    # replicated across the dh lanes of its head (everything stays 128-lane dense).
    s = jnp.dot(x, wks_ref[...], preferred_element_type=f32) + bks_ref[...]   # (N, D)
    v = jnp.dot(x, wv_ref[...], preferred_element_type=f32) + bv_ref[...]     # (N, D)

    s3 = s.reshape(bb, seq_len, d_model)
    s3 = s3 - jnp.max(s3, axis=1, keepdims=True)                      # softmax over keys
    e = jnp.exp(s3)                                                   # (bb, L, D), f32

    # Deferred softmax normalization: pool first, divide the (bb, D) result once.
    numer = jnp.sum(e * v.reshape(bb, seq_len, d_model), axis=1)      # (bb, D)
    denom = jnp.sum(e, axis=1)                                        # (bb, D)
    attn = numer * pl.reciprocal(denom, approx=True)

    # Attention output projection.
    attn = jnp.dot(attn.astype(mm_dtype), wo_ref[...],
                   preferred_element_type=f32) + bo_ref[...]          # (bb, D)

    # LayerNorm (eps matches nn.LayerNorm default), f32 math.
    mu = jnp.mean(attn, axis=-1, keepdims=True)
    cen = attn - mu
    var = jnp.mean(cen * cen, axis=-1, keepdims=True)
    y = cen * lax.rsqrt(var + ln_eps) * ln_g_ref[...] + ln_b_ref[...]

    # MlpBlock (Linear -> GELU -> Linear) with residual around it.
    h = jnp.dot(y.astype(mm_dtype), w1_ref[...], preferred_element_type=f32) + b1_ref[...]
    h = _gelu_tanh(h)
    mlp = jnp.dot(h.astype(mm_dtype), w2_ref[...], preferred_element_type=f32) + b2_ref[...]
    pooled = attn + mlp                                               # (bb, D)

    # Final projection (output already padded to a lane-dense width in the wrapper).
    out = jnp.dot(pooled.astype(mm_dtype), wp_ref[...],
                  preferred_element_type=f32) + bp_ref[...]
    o_ref[...] = out.astype(o_ref.dtype)


@functools.partial(jax.jit, static_argnames=("num_heads", "block_b", "matmul_dtype"))
def continuous_action_head_forward(x, params, *, num_heads, block_b=None,
                                   matmul_dtype=jnp.bfloat16):
    """Runs the fused ContinuousActionHead kernel.

    x:            (B, L, D) activations.
    params:       dict of weights (in, out) / biases (1, out); see init function.
    block_b:      optional batch tile size (rounded to a multiple of 8; batch zero-padded).
                  Default: occupancy-aware tiling (bb*L >= 256 rows, >= 2 grid steps when
                  the batch allows so v7x can use both TensorCores, capped at 256 rows).
    matmul_dtype: dtype of MXU operands (bf16 default; accumulation is always f32).
    Returns: (B, 1, output_size) — matches the PyTorch module (num_readouts = 1).
    """
    f32 = jnp.float32
    B, L, D = x.shape
    assert D % num_heads == 0, "input_size must be divisible by num_heads"
    dh = D // num_heads
    scale = 1.0 / (float(dh) ** 0.5)
    d_out = params["w_proj"].shape[1]
    mlp_dim = params["w1"].shape[1]
    hi = lax.Precision.HIGHEST

    # --- fold probe query + per-head score structure + 1/sqrt(dh) into (Wk_s, bk_s) ---
    # s[n, e] = scale * sum_d (x[n]·wk[:,d] + bk[d]) * q[d] * [head(d) == head(e)]
    #         = (x @ Wk_s + bk_s)[n, e]
    q = jnp.dot(params["p"].astype(f32), params["wq"].astype(f32),
                precision=hi) + params["bq"].astype(f32)                      # (1, D)

    def head_fold(w):
        # sum over the query lanes of each head, replicate across that head's dh lanes
        hs = (w * q).reshape(w.shape[0], num_heads, dh).sum(axis=-1)          # (., H)
        return scale * jnp.repeat(hs, dh, axis=-1)                            # (., D)

    wks = head_fold(params["wk"].astype(f32))                                 # (D, D)
    bks = head_fold(params["bk"].astype(f32))                                 # (1, D)

    # --- lane-dense output: pad the projection to a multiple of 128 lanes (slice after) ---
    d_out_pad = ((d_out + 127) // 128) * 128
    wp = jnp.pad(params["w_proj"], ((0, 0), (0, d_out_pad - d_out)))
    bp = jnp.pad(params["b_proj"], ((0, 0), (0, d_out_pad - d_out)))

    # --- dtypes: matmul weights in matmul_dtype, biases / LN params in f32 ---
    mm = lambda a: a.astype(matmul_dtype)
    ff = lambda a: a.astype(f32)
    weight_args = (mm(wks), ff(bks),
                   mm(params["wv"]), ff(params["bv"]),
                   mm(params["wo"]), ff(params["bo"]),
                   ff(params["ln_g"]), ff(params["ln_b"]),
                   mm(params["w1"]), ff(params["b1"]),
                   mm(params["w2"]), ff(params["b2"]),
                   mm(wp), ff(bp))

    # --- batch tiling (occupancy + megacore aware) ---
    if block_b is None:
        min_bb = ((max(8, pl.cdiv(256, max(L, 1))) + 7) // 8) * 8   # bb*L >= 256 rows
        if B <= min_bb:
            bb = B                                                  # one grid step
        else:
            half = ((pl.cdiv(B, 2) + 7) // 8) * 8                   # >= 2 steps (v7x 2 TCs)
            bb = max(min_bb, min(half, 256))                        # VMEM-friendly cap
    elif block_b >= B:
        bb = B
    else:
        bb = max(8, (block_b // 8) * 8)
    B_pad = pl.cdiv(B, bb) * bb
    x_p = x if B_pad == B else jnp.pad(x, ((0, B_pad - B), (0, 0), (0, 0)))
    x_p = x_p.astype(matmul_dtype)

    kernel = functools.partial(_action_head_kernel, ln_eps=1e-5)

    # Weights/biases: full-array blocks with constant index maps -> resident in VMEM.
    # At large D single-buffer them (blocks never change; halves resident weight VMEM,
    # matters on v7x's 64 MiB).  At D=128 the default double-buffering is irrelevant.
    if D >= 1024:
        full = lambda arr: pl.BlockSpec(arr.shape, lambda i: (0, 0),
                                        pipeline_mode=pl.Buffered(1))
    else:
        full = lambda arr: pl.BlockSpec(arr.shape, lambda i: (0, 0))

    # Advisory cost estimate so XLA schedules the wrapper pad/slice around the call.
    n_rows = B_pad * L
    flops = (2 * n_rows * D * D * 2
             + 2 * B_pad * (D * D + 2 * D * mlp_dim + D * d_out_pad))
    transcendentals = n_rows * D + B_pad * mlp_dim + B_pad * D
    weight_bytes = sum(int(a.size) * a.dtype.itemsize for a in weight_args)
    bytes_accessed = (int(x_p.size) * x_p.dtype.itemsize + weight_bytes
                      + B_pad * d_out_pad * x.dtype.itemsize)
    cost = pl.CostEstimate(flops=int(flops), transcendentals=int(transcendentals),
                           bytes_accessed=int(bytes_accessed))

    # Only raise the scoped-VMEM limit when the working set actually needs it
    # (never on the default small-D path); cap at 64 MiB so it is valid on v7x too.
    itemsize_mm = jnp.dtype(matmul_dtype).itemsize
    est_vmem = (2 * weight_bytes
                + 2 * bb * L * D * itemsize_mm       # double-buffered x tiles
                + 6 * bb * L * D * 4                 # f32 intermediates (s, v, e, ...)
                + 2 * bb * d_out_pad * x.dtype.itemsize)
    vmem_limit = None
    if est_vmem > 24 * 1024 * 1024:
        vmem_limit = min(max(32 * 1024 * 1024, int(1.5 * est_vmem)), 64 * 1024 * 1024)

    out = pl.pallas_call(
        kernel,
        out_shape=jax.ShapeDtypeStruct((B_pad, d_out_pad), x.dtype),
        grid_spec=pltpu.PrefetchScalarGridSpec(
            num_scalar_prefetch=0,
            grid=(B_pad // bb,),
            in_specs=[pl.BlockSpec((bb, L, D), lambda i: (i, 0, 0))]
                     + [full(a) for a in weight_args],
            out_specs=pl.BlockSpec((bb, d_out_pad), lambda i: (i, 0)),
        ),
        compiler_params=pltpu.CompilerParams(
            dimension_semantics=("parallel",),
            vmem_limit_bytes=vmem_limit),
        cost_estimate=cost,
    )(x_p, *weight_args)

    return out[:B, :d_out].reshape(B, 1, d_out)


# ----------------------------- parameter init & reference -----------------------------

def _xavier_uniform(key, fan_in, fan_out, dtype=jnp.float32):
    limit = (6.0 / (fan_in + fan_out)) ** 0.5
    return jax.random.uniform(key, (fan_in, fan_out), minval=-limit, maxval=limit,
                              dtype=dtype)


def init_continuous_action_head_params(key, input_size, output_size, num_heads,
                                       mlp_dim=None):
    """Weights (in, out), biases (1, out). num_readouts is fixed to 1 (module default)."""
    del num_heads  # shapes don't depend on it (heads split D)
    D = input_size
    M = 4 * D if mlp_dim is None else mlp_dim
    ks = jax.random.split(key, 17)
    nrm = lambda k, shape, s=0.2: s * jax.random.normal(k, shape, jnp.float32)
    return {
        "p": _xavier_uniform(ks[0], 1, D),                  # learned probe token
        "wq": _xavier_uniform(ks[1], D, D), "bq": nrm(ks[2], (1, D)),
        "wk": _xavier_uniform(ks[3], D, D), "bk": nrm(ks[4], (1, D)),
        "wv": _xavier_uniform(ks[5], D, D), "bv": nrm(ks[6], (1, D)),
        "wo": _xavier_uniform(ks[7], D, D), "bo": nrm(ks[8], (1, D)),
        "ln_g": 1.0 + nrm(ks[9], (1, D), 0.1), "ln_b": nrm(ks[10], (1, D)),
        "w1": _xavier_uniform(ks[11], D, M), "b1": nrm(ks[12], (1, M)),
        "w2": _xavier_uniform(ks[13], M, D), "b2": nrm(ks[14], (1, D)),
        "w_proj": _xavier_uniform(ks[15], D, output_size),
        "b_proj": nrm(ks[16], (1, output_size)),
    }


def continuous_action_head_reference(x, params, *, num_heads):
    """Plain-JAX reference (explicit multi-head attention) for correctness checking."""
    hi = lax.Precision.HIGHEST
    mm = lambda a, b: jnp.dot(a, b, precision=hi)
    B, L, D = x.shape
    dh = D // num_heads

    q = (mm(params["p"], params["wq"]) + params["bq"]).reshape(num_heads, dh)
    k = jnp.einsum("bld,de->ble", x, params["wk"], precision=hi) + params["bk"]
    v = jnp.einsum("bld,de->ble", x, params["wv"], precision=hi) + params["bv"]
    kh = k.reshape(B, L, num_heads, dh)
    vh = v.reshape(B, L, num_heads, dh)

    s = jnp.einsum("hd,blhd->bhl", q, kh, precision=hi) / (float(dh) ** 0.5)
    w = jax.nn.softmax(s, axis=-1)
    a = jnp.einsum("bhl,blhd->bhd", w, vh, precision=hi).reshape(B, D)
    attn = mm(a, params["wo"]) + params["bo"]

    mu = attn.mean(axis=-1, keepdims=True)
    cen = attn - mu
    var = (cen * cen).mean(axis=-1, keepdims=True)
    y = cen * lax.rsqrt(var + 1e-5) * params["ln_g"] + params["ln_b"]

    h = _gelu_tanh(mm(y, params["w1"]) + params["b1"])
    mlp = mm(h, params["w2"]) + params["b2"]
    pooled = attn + mlp

    out = mm(pooled, params["w_proj"]) + params["b_proj"]
    return out.reshape(B, 1, -1)


if __name__ == "__main__":
    key = jax.random.PRNGKey(0)
    k_x, k_p, k_x2 = jax.random.split(key, 3)

    # Small shapes consistent with the module: ContinuousActionHead(input_size=128,
    # output_size=7, num_heads=8) on a (B=4, L=16, D=128) token sequence.
    B, L, D, H, d_out = 4, 16, 128, 8, 7
    x = jax.random.normal(k_x, (B, L, D), dtype=jnp.float32)
    params = init_continuous_action_head_params(k_p, D, d_out, H)
    ref = continuous_action_head_reference(x, params, num_heads=H)

    # Exact (f32) matmul path: validates the folded-attention algebra tightly.
    out_f32 = jax.block_until_ready(
        continuous_action_head_forward(x, params, num_heads=H,
                                       matmul_dtype=jnp.float32))
    assert out_f32.shape == (B, 1, d_out)
    assert jnp.allclose(out_f32, ref, atol=5e-3, rtol=5e-3), "mismatch (f32 path)"

    # Default bf16 matmul path (f32 accumulation) — bf16-appropriate tolerance.
    out_bf16 = jax.block_until_ready(
        continuous_action_head_forward(x, params, num_heads=H))
    assert out_bf16.shape == (B, 1, d_out)
    assert jnp.allclose(out_bf16, ref, atol=3e-2, rtol=3e-2), "mismatch (bf16 path)"

    # Tiled-batch path with a ragged batch (pads to a multiple of the 8-row tile).
    B2 = 20
    x2 = jax.random.normal(k_x2, (B2, L, D), dtype=jnp.float32)
    out2 = jax.block_until_ready(
        continuous_action_head_forward(x2, params, num_heads=H, block_b=8))
    ref2 = continuous_action_head_reference(x2, params, num_heads=H)
    assert out2.shape == (B2, 1, d_out)
    assert jnp.allclose(out2, ref2, atol=3e-2, rtol=3e-2), "mismatch (tiled path)"

    print("KERNEL_OK")
</pallas_src>

<mosaic_0001>
module attributes {stable_mosaic.version = 11 : i64} {
  func.func @_action_head_kernel(%arg0: i32, %arg1: memref<4x16x128xf32, #tpu.memory_space<vmem>>, %arg2: memref<128x128xf32, #tpu.memory_space<vmem>>, %arg3: memref<1x128xf32, #tpu.memory_space<vmem>>, %arg4: memref<128x128xf32, #tpu.memory_space<vmem>>, %arg5: memref<1x128xf32, #tpu.memory_space<vmem>>, %arg6: memref<128x128xf32, #tpu.memory_space<vmem>>, %arg7: memref<1x128xf32, #tpu.memory_space<vmem>>, %arg8: memref<1x128xf32, #tpu.memory_space<vmem>>, %arg9: memref<1x128xf32, #tpu.memory_space<vmem>>, %arg10: memref<128x512xf32, #tpu.memory_space<vmem>>, %arg11: memref<1x512xf32, #tpu.memory_space<vmem>>, %arg12: memref<512x128xf32, #tpu.memory_space<vmem>>, %arg13: memref<1x128xf32, #tpu.memory_space<vmem>>, %arg14: memref<128x128xf32, #tpu.memory_space<vmem>>, %arg15: memref<1x128xf32, #tpu.memory_space<vmem>>, %arg16: memref<4x128xf32, #tpu.memory_space<vmem>>) attributes {dimension_semantics = [#tpu.dimension_semantics<parallel>], iteration_bounds = array<i64: 1>, scalar_prefetch = 0 : i64, scratch_operands = 0 : i64, tpu.core_type = #tpu.core_type<tc>, window_params = [{transform_indices = @transform_0, window_bounds = array<i64: 4, 16, 128>}, {pipeline_mode = #tpu.pipeline_mode<synchronous>, transform_indices = @transform_1, window_bounds = array<i64: 128, 128>}, {pipeline_mode = #tpu.pipeline_mode<synchronous>, transform_indices = @transform_2, window_bounds = array<i64: 1, 128>}, {pipeline_mode = #tpu.pipeline_mode<synchronous>, transform_indices = @transform_3, window_bounds = array<i64: 128, 128>}, {pipeline_mode = #tpu.pipeline_mode<synchronous>, transform_indices = @transform_4, window_bounds = array<i64: 1, 128>}, {pipeline_mode = #tpu.pipeline_mode<synchronous>, transform_indices = @transform_5, window_bounds = array<i64: 128, 128>}, {pipeline_mode = #tpu.pipeline_mode<synchronous>, transform_indices = @transform_6, window_bounds = array<i64: 1, 128>}, {pipeline_mode = #tpu.pipeline_mode<synchronous>, transform_indices = @transform_7, window_bounds = array<i64: 1, 128>}, {pipeline_mode = #tpu.pipeline_mode<synchronous>, transform_indices = @transform_8, window_bounds = array<i64: 1, 128>}, {pipeline_mode = #tpu.pipeline_mode<synchronous>, transform_indices = @transform_9, window_bounds = array<i64: 128, 512>}, {pipeline_mode = #tpu.pipeline_mode<synchronous>, transform_indices = @transform_10, window_bounds = array<i64: 1, 512>}, {pipeline_mode = #tpu.pipeline_mode<synchronous>, transform_indices = @transform_11, window_bounds = array<i64: 512, 128>}, {pipeline_mode = #tpu.pipeline_mode<synchronous>, transform_indices = @transform_12, window_bounds = array<i64: 1, 128>}, {pipeline_mode = #tpu.pipeline_mode<synchronous>, transform_indices = @transform_13, window_bounds = array<i64: 128, 128>}, {pipeline_mode = #tpu.pipeline_mode<synchronous>, transform_indices = @transform_14, window_bounds = array<i64: 1, 128>}, {transform_indices = @transform_15, window_bounds = array<i64: 4, 128>}]} {
    %c0 = arith.constant 0 : index
    %c0_0 = arith.constant 0 : index
    %c0_1 = arith.constant 0 : index
    %0 = vector.load %arg1[%c0, %c0_0, %c0_1] : memref<4x16x128xf32, #tpu.memory_space<vmem>>, vector<4x16x128xf32>
    %1 = vector.shape_cast %0 : vector<4x16x128xf32> to vector<64x128xf32>
    %c0_2 = arith.constant 0 : index
    %c0_3 = arith.constant 0 : index
    %2 = vector.load %arg2[%c0_2, %c0_3] : memref<128x128xf32, #tpu.memory_space<vmem>>, vector<128x128xf32>
    %cst = arith.constant dense<0.000000e+00> : vector<64x128xf32>
    %3 = tpu.matmul %1, %2, %cst {dimension_numbers = #tpu.dot_dimension_numbers<[1], [0], [0], [1], [0, 0, 1, 1], [], []>} : vector<64x128xf32>, vector<128x128xf32>, vector<64x128xf32> -> vector<64x128xf32>
    %c0_4 = arith.constant 0 : index
    %c0_5 = arith.constant 0 : index
    %4 = vector.load %arg3[%c0_4, %c0_5] : memref<1x128xf32, #tpu.memory_space<vmem>>, vector<1x128xf32>
    %5 = vector.broadcast %4 : vector<1x128xf32> to vector<64x128xf32>
    %6 = arith.addf %3, %5 : vector<64x128xf32>
    %c0_6 = arith.constant 0 : index
    %c0_7 = arith.constant 0 : index
    %7 = vector.load %arg4[%c0_6, %c0_7] : memref<128x128xf32, #tpu.memory_space<vmem>>, vector<128x128xf32>
    %cst_8 = arith.constant dense<0.000000e+00> : vector<64x128xf32>
    %8 = tpu.matmul %1, %7, %cst_8 {dimension_numbers = #tpu.dot_dimension_numbers<[1], [0], [0], [1], [0, 0, 1, 1], [], []>} : vector<64x128xf32>, vector<128x128xf32>, vector<64x128xf32> -> vector<64x128xf32>
    %c0_9 = arith.constant 0 : index
    %c0_10 = arith.constant 0 : index
    %9 = vector.load %arg5[%c0_9, %c0_10] : memref<1x128xf32, #tpu.memory_space<vmem>>, vector<1x128xf32>
    %10 = vector.broadcast %9 : vector<1x128xf32> to vector<64x128xf32>
    %11 = arith.addf %8, %10 : vector<64x128xf32>
    %12 = vector.shape_cast %6 : vector<64x128xf32> to vector<4x16x128xf32>
    %cst_11 = arith.constant dense<0xFF800000> : vector<4x128xf32>
    %13 = vector.multi_reduction <maximumf>, %12, %cst_11 [1] : vector<4x16x128xf32> to vector<4x128xf32>
    %14 = vector.shape_cast %13 : vector<4x128xf32> to vector<4x1x128xf32>
    %15 = vector.broadcast %14 : vector<4x1x128xf32> to vector<4x16x128xf32>
    %16 = arith.subf %12, %15 : vector<4x16x128xf32>
    %17 = math.exp %16 : vector<4x16x128xf32>
    %18 = vector.shape_cast %11 : vector<64x128xf32> to vector<4x16x128xf32>
    %19 = arith.mulf %17, %18 : vector<4x16x128xf32>
    %cst_12 = arith.constant dense<0.000000e+00> : vector<4x128xf32>
    %20 = vector.multi_reduction <add>, %19, %cst_12 [1] : vector<4x16x128xf32> to vector<4x128xf32>
    %cst_13 = arith.constant dense<0.000000e+00> : vector<4x128xf32>
    %21 = vector.multi_reduction <add>, %17, %cst_13 [1] : vector<4x16x128xf32> to vector<4x128xf32>
    %22 = tpu.reciprocal %21 {approx = true} : vector<4x128xf32> -> vector<4x128xf32>
    %23 = arith.mulf %20, %22 : vector<4x128xf32>
    %c0_14 = arith.constant 0 : index
    %c0_15 = arith.constant 0 : index
    %24 = vector.load %arg6[%c0_14, %c0_15] : memref<128x128xf32, #tpu.memory_space<vmem>>, vector<128x128xf32>
    %cst_16 = arith.constant dense<0.000000e+00> : vector<4x128xf32>
    %25 = tpu.matmul %23, %24, %cst_16 {dimension_numbers = #tpu.dot_dimension_numbers<[1], [0], [0], [1], [0, 0, 1, 1], [], []>} : vector<4x128xf32>, vector<128x128xf32>, vector<4x128xf32> -> vector<4x128xf32>
    %c0_17 = arith.constant 0 : index
    %c0_18 = arith.constant 0 : index
    %26 = vector.load %arg7[%c0_17, %c0_18] : memref<1x128xf32, #tpu.memory_space<vmem>>, vector<1x128xf32>
    %27 = vector.broadcast %26 : vector<1x128xf32> to vector<4x128xf32>
    %28 = arith.addf %25, %27 : vector<4x128xf32>
    %cst_19 = arith.constant dense<0.000000e+00> : vector<4xf32>
    %29 = vector.multi_reduction <add>, %28, %cst_19 [1] : vector<4x128xf32> to vector<4xf32>
    %30 = vector.shape_cast %29 : vector<4xf32> to vector<4x1xf32>
    %cst_20 = arith.constant 1.280000e+02 : f32
    %31 = vector.broadcast %cst_20 : f32 to vector<4x1xf32>
    %32 = arith.divf %30, %31 : vector<4x1xf32>
    %33 = vector.broadcast %32 : vector<4x1xf32> to vector<4x128xf32>
    %34 = arith.subf %28, %33 : vector<4x128xf32>
    %35 = arith.mulf %34, %34 : vector<4x128xf32>
    %cst_21 = arith.constant dense<0.000000e+00> : vector<4xf32>
    %36 = vector.multi_reduction <add>, %35, %cst_21 [1] : vector<4x128xf32> to vector<4xf32>
    %37 = vector.shape_cast %36 : vector<4xf32> to vector<4x1xf32>
    %cst_22 = arith.constant 1.280000e+02 : f32
    %38 = vector.broadcast %cst_22 : f32 to vector<4x1xf32>
    %39 = arith.divf %37, %38 : vector<4x1xf32>
    %cst_23 = arith.constant 9.99999974E-6 : f32
    %40 = vector.broadcast %cst_23 : f32 to vector<4x1xf32>
    %41 = arith.addf %39, %40 : vector<4x1xf32>
    %42 = math.rsqrt %41 : vector<4x1xf32>
    %43 = vector.broadcast %42 : vector<4x1xf32> to vector<4x128xf32>
    %44 = arith.mulf %34, %43 : vector<4x128xf32>
    %c0_24 = arith.constant 0 : index
    %c0_25 = arith.constant 0 : index
    %45 = vector.load %arg8[%c0_24, %c0_25] : memref<1x128xf32, #tpu.memory_space<vmem>>, vector<1x128xf32>
    %46 = vector.broadcast %45 : vector<1x128xf32> to vector<4x128xf32>
    %47 = arith.mulf %44, %46 : vector<4x128xf32>
    %c0_26 = arith.constant 0 : index
    %c0_27 = arith.constant 0 : index
    %48 = vector.load %arg9[%c0_26, %c0_27] : memref<1x128xf32, #tpu.memory_space<vmem>>, vector<1x128xf32>
    %49 = vector.broadcast %48 : vector<1x128xf32> to vector<4x128xf32>
    %50 = arith.addf %47, %49 : vector<4x128xf32>
    %c0_28 = arith.constant 0 : index
    %c0_29 = arith.constant 0 : index
    %51 = vector.load %arg10[%c0_28, %c0_29] : memref<128x512xf32, #tpu.memory_space<vmem>>, vector<128x512xf32>
    %cst_30 = arith.constant dense<0.000000e+00> : vector<4x512xf32>
    %52 = tpu.matmul %50, %51, %cst_30 {dimension_numbers = #tpu.dot_dimension_numbers<[1], [0], [0], [1], [0, 0, 1, 1], [], []>} : vector<4x128xf32>, vector<128x512xf32>, vector<4x512xf32> -> vector<4x512xf32>
    %c0_31 = arith.constant 0 : index
    %c0_32 = arith.constant 0 : index
    %53 = vector.load %arg11[%c0_31, %c0_32] : memref<1x512xf32, #tpu.memory_space<vmem>>, vector<1x512xf32>
    %54 = vector.broadcast %53 : vector<1x512xf32> to vector<4x512xf32>
    %55 = arith.addf %52, %54 : vector<4x512xf32>
    %cst_33 = arith.constant 5.000000e-01 : f32
    %56 = vector.broadcast %cst_33 : f32 to vector<4x512xf32>
    %57 = arith.mulf %56, %55 : vector<4x512xf32>
    %58 = arith.mulf %55, %55 : vector<4x512xf32>
    %59 = arith.mulf %58, %55 : vector<4x512xf32>
    %cst_34 = arith.constant 4.471500e-02 : f32
    %60 = vector.broadcast %cst_34 : f32 to vector<4x512xf32>
    %61 = arith.mulf %60, %59 : vector<4x512xf32>
    %62 = arith.addf %55, %61 : vector<4x512xf32>
    %cst_35 = arith.constant 0.797884583 : f32
    %63 = vector.broadcast %cst_35 : f32 to vector<4x512xf32>
    %64 = arith.mulf %63, %62 : vector<4x512xf32>
    %65 = math.tanh %64 : vector<4x512xf32>
    %cst_36 = arith.constant 1.000000e+00 : f32
    %66 = vector.broadcast %cst_36 : f32 to vector<4x512xf32>
    %67 = arith.addf %66, %65 : vector<4x512xf32>
    %68 = arith.mulf %57, %67 : vector<4x512xf32>
    %c0_37 = arith.constant 0 : index
    %c0_38 = arith.constant 0 : index
    %69 = vector.load %arg12[%c0_37, %c0_38] : memref<512x128xf32, #tpu.memory_space<vmem>>, vector<512x128xf32>
    %cst_39 = arith.constant dense<0.000000e+00> : vector<4x128xf32>
    %70 = tpu.matmul %68, %69, %cst_39 {dimension_numbers = #tpu.dot_dimension_numbers<[1], [0], [0], [1], [0, 0, 1, 1], [], []>} : vector<4x512xf32>, vector<512x128xf32>, vector<4x128xf32> -> vector<4x128xf32>
    %c0_40 = arith.constant 0 : index
    %c0_41 = arith.constant 0 : index
    %71 = vector.load %arg13[%c0_40, %c0_41] : memref<1x128xf32, #tpu.memory_space<vmem>>, vector<1x128xf32>
    %72 = vector.broadcast %71 : vector<1x128xf32> to vector<4x128xf32>
    %73 = arith.addf %70, %72 : vector<4x128xf32>
    %74 = arith.addf %28, %73 : vector<4x128xf32>
    %c0_42 = arith.constant 0 : index
    %c0_43 = arith.constant 0 : index
    %75 = vector.load %arg14[%c0_42, %c0_43] : memref<128x128xf32, #tpu.memory_space<vmem>>, vector<128x128xf32>
    %cst_44 = arith.constant dense<0.000000e+00> : vector<4x128xf32>
    %76 = tpu.matmul %74, %75, %cst_44 {dimension_numbers = #tpu.dot_dimension_numbers<[1], [0], [0], [1], [0, 0, 1, 1], [], []>} : vector<4x128xf32>, vector<128x128xf32>, vector<4x128xf32> -> vector<4x128xf32>
    %c0_45 = arith.constant 0 : index
    %c0_46 = arith.constant 0 : index
    %77 = vector.load %arg15[%c0_45, %c0_46] : memref<1x128xf32, #tpu.memory_space<vmem>>, vector<1x128xf32>
    %78 = vector.broadcast %77 : vector<1x128xf32> to vector<4x128xf32>
    %79 = arith.addf %76, %78 : vector<4x128xf32>
    %c0_47 = arith.constant 0 : index
    %c0_48 = arith.constant 0 : index
    %80 = vector.load %arg16[%c0_47, %c0_48] : memref<4x128xf32, #tpu.memory_space<vmem>>, vector<4x128xf32>
    tpu.vector_store %arg16[%c0_47, %c0_48], %79 {strides = array<i32>} : memref<4x128xf32, #tpu.memory_space<vmem>>, vector<4x128xf32>,
    return
  }
  func.func @transform_0(%arg0: i32) -> (i32, i32, i32) {
    %c0_i32 = arith.constant 0 : i32
    %c0_i32_0 = arith.constant 0 : i32
    %c0_i32_1 = arith.constant 0 : i32
    return %arg0, %c0_i32, %c0_i32_0 : i32, i32, i32
  }
  func.func @transform_1(%arg0: i32) -> (i32, i32) {
    %c0_i32 = arith.constant 0 : i32
    %c0_i32_0 = arith.constant 0 : i32
    %c0_i32_1 = arith.constant 0 : i32
    return %c0_i32, %c0_i32_0 : i32, i32
  }
  func.func @transform_2(%arg0: i32) -> (i32, i32) {
    %c0_i32 = arith.constant 0 : i32
    %c0_i32_0 = arith.constant 0 : i32
    %c0_i32_1 = arith.constant 0 : i32
    return %c0_i32, %c0_i32_0 : i32, i32
  }
  func.func @transform_3(%arg0: i32) -> (i32, i32) {
    %c0_i32 = arith.constant 0 : i32
    %c0_i32_0 = arith.constant 0 : i32
    %c0_i32_1 = arith.constant 0 : i32
    return %c0_i32, %c0_i32_0 : i32, i32
  }
  func.func @transform_4(%arg0: i32) -> (i32, i32) {
    %c0_i32 = arith.constant 0 : i32
    %c0_i32_0 = arith.constant 0 : i32
    %c0_i32_1 = arith.constant 0 : i32
    return %c0_i32, %c0_i32_0 : i32, i32
  }
  func.func @transform_5(%arg0: i32) -> (i32, i32) {
    %c0_i32 = arith.constant 0 : i32
    %c0_i32_0 = arith.constant 0 : i32
    %c0_i32_1 = arith.constant 0 : i32
    return %c0_i32, %c0_i32_0 : i32, i32
  }
  func.func @transform_6(%arg0: i32) -> (i32, i32) {
    %c0_i32 = arith.constant 0 : i32
    %c0_i32_0 = arith.constant 0 : i32
    %c0_i32_1 = arith.constant 0 : i32
    return %c0_i32, %c0_i32_0 : i32, i32
  }
  func.func @transform_7(%arg0: i32) -> (i32, i32) {
    %c0_i32 = arith.constant 0 : i32
    %c0_i32_0 = arith.constant 0 : i32
    %c0_i32_1 = arith.constant 0 : i32
    return %c0_i32, %c0_i32_0 : i32, i32
  }
  func.func @transform_8(%arg0: i32) -> (i32, i32) {
    %c0_i32 = arith.constant 0 : i32
    %c0_i32_0 = arith.constant 0 : i32
    %c0_i32_1 = arith.constant 0 : i32
    return %c0_i32, %c0_i32_0 : i32, i32
  }
  func.func @transform_9(%arg0: i32) -> (i32, i32) {
    %c0_i32 = arith.constant 0 : i32
    %c0_i32_0 = arith.constant 0 : i32
    %c0_i32_1 = arith.constant 0 : i32
    return %c0_i32, %c0_i32_0 : i32, i32
  }
  func.func @transform_10(%arg0: i32) -> (i32, i32) {
    %c0_i32 = arith.constant 0 : i32
    %c0_i32_0 = arith.constant 0 : i32
    %c0_i32_1 = arith.constant 0 : i32
    return %c0_i32, %c0_i32_0 : i32, i32
  }
  func.func @transform_11(%arg0: i32) -> (i32, i32) {
    %c0_i32 = arith.constant 0 : i32
    %c0_i32_0 = arith.constant 0 : i32
    %c0_i32_1 = arith.constant 0 : i32
    return %c0_i32, %c0_i32_0 : i32, i32
  }
  func.func @transform_12(%arg0: i32) -> (i32, i32) {
    %c0_i32 = arith.constant 0 : i32
    %c0_i32_0 = arith.constant 0 : i32
    %c0_i32_1 = arith.constant 0 : i32
    return %c0_i32, %c0_i32_0 : i32, i32
  }
  func.func @transform_13(%arg0: i32) -> (i32, i32) {
    %c0_i32 = arith.constant 0 : i32
    %c0_i32_0 = arith.constant 0 : i32
    %c0_i32_1 = arith.constant 0 : i32
    return %c0_i32, %c0_i32_0 : i32, i32
  }
  func.func @transform_14(%arg0: i32) -> (i32, i32) {
    %c0_i32 = arith.constant 0 : i32
    %c0_i32_0 = arith.constant 0 : i32
    %c0_i32_1 = arith.constant 0 : i32
    return %c0_i32, %c0_i32_0 : i32, i32
  }
  func.func @transform_15(%arg0: i32) -> (i32, i32) {
    %c0_i32 = arith.constant 0 : i32
    %c0_i32_0 = arith.constant 0 : i32
    return %arg0, %c0_i32 : i32, i32
  }
}

</mosaic_0001>

<bundles_post_ra>
// kernel: continuous_action_head_forward.1
= control target key start
LH: loop header
LB: loop body
LE: loop exit
PB: predicated region body
PF: predicated region fallthrough
CT: control target
= control target key end

     0   :  { %s2298_s0 = inlined_call_operand.vmem [shape: f32[4,16,128], index: 0, kind: input, shape index: {}]   ;;  %s2299_s1 = inlined_call_operand.vmem [shape: f32[128,128], index: 1, kind: input, shape index: {}]   ;;  %s2300_s2 = inlined_call_operand.vmem [shape: f32[1,128], index: 2, kind: input, shape index: {}]   ;;  %s2301_s3 = inlined_call_operand.vmem [shape: f32[128,128], index: 3, kind: input, shape index: {}]   ;;  %s2302_s4 = inlined_call_operand.vmem [shape: f32[1,128], index: 4, kind: input, shape index: {}]   ;;  %s2303_s5 = inlined_call_operand.vmem [shape: f32[128,128], index: 5, kind: input, shape index: {}]   ;;  %s2304_s6 = inlined_call_operand.vmem [shape: f32[1,128], index: 6, kind: input, shape index: {}]   ;;  %s2305_s7 = inlined_call_operand.vmem [shape: f32[1,128], index: 7, kind: input, shape index: {}]   ;;  %s2306_s8 = inlined_call_operand.vmem [shape: f32[1,128], index: 8, kind: input, shape index: {}]   ;;  %s2307_s9 = inlined_call_operand.vmem [shape: f32[128,512], index: 9, kind: input, shape index: {}]   ;;  %s2308_s10 = inlined_call_operand.vmem [shape: f32[1,512], index: 10, kind: input, shape index: {}]   ;;  %s2309_s11 = inlined_call_operand.vmem [shape: f32[512,128], index: 11, kind: input, shape index: {}]   ;;  %s2310_s12 = inlined_call_operand.vmem [shape: f32[1,128], index: 12, kind: input, shape index: {}]   ;;  %s2311_s13 = inlined_call_operand.vmem [shape: f32[128,128], index: 13, kind: input, shape index: {}]   ;;  %s2312_s14 = inlined_call_operand.vmem [shape: f32[1,128], index: 14, kind: input, shape index: {}]   ;;  %s2313_s15 = inlined_call_operand.hbm [shape: f32[4,128], index: 15, kind: output, shape index: {}]  }
   0x1   :  { %v74_v0 = vld [vmem:[%s2299_s1 + $0x78] sm:$0xff]  ;;  %v73_v1 = vld [vmem:[%s2299_s1 + $0x70] sm:$0xff]  ;;  %v72_v2 = vld [vmem:[%s2299_s1 + $0x68] sm:$0xff] }
   0x2   :  { %1317 = vmatprep.subr.mxu0 %v74_v0  ;;  %v71_v3 = vld [vmem:[%s2299_s1 + $0x60] sm:$0xff]  ;;  %v70_v5 = vld [vmem:[%s2299_s1 + $0x58] sm:$0xff]  ;;  %v201_v7 = vld [vmem:[%s2301_s3 + $0x70] sm:$0xff] }
   0x3   :  { %1318 = vmatpush3.msra.mxu0 %v74_v0  ;;  %v1632_v4 = vld [vmem:[%s2298_s0] sm:$0xff]  ;;  %v202_v6 = vld [vmem:[%s2301_s3 + $0x78] sm:$0xff]  ;;  %v69_v8 = vld [vmem:[%s2299_s1 + $0x50] sm:$0xff] }
   0x4   :  { %1319 = vmatprep.subr.mxu0 %v73_v1  ;;  %1349 = vmatprep.mubr.f32.mxu0 %v1632_v4  ;;  %v200_v9 = vld [vmem:[%s2301_s3 + $0x68] sm:$0xff]  ;;  %v199_v11 = vld [vmem:[%s2301_s3 + $0x60] sm:$0xff]  ;;  %v198_v13 = vld [vmem:[%s2301_s3 + $0x58] sm:$0xff] }
   0x5   :  { %1320 = vmatpush3.msra.mxu0 %v73_v1  ;;  %1361 = vmatprep.subr.mxu1 %v202_v6  ;;  %v68_v10 = vld [vmem:[%s2299_s1 + $0x48] sm:$0xff]  ;;  %v67_v12 = vld [vmem:[%s2299_s1 + $0x40] sm:$0xff] }
   0x6   :  { %1321 = vmatprep.subr.mxu0 %v72_v2  ;;  %1362 = vmatpush3.msra.mxu1 %v202_v6 }
   0x7   :  { %1322 = vmatpush3.msra.mxu0 %v72_v2  ;;  %1363 = vmatprep.subr.mxu1 %v201_v7 }
   0x8   :  { %1323 = vmatprep.subr.mxu0 %v71_v3  ;;  %1364 = vmatpush3.msra.mxu1 %v201_v7 }
   0x9   :  { %1324 = vmatpush3.msra.mxu0 %v71_v3  ;;  %1365 = vmatprep.subr.mxu1 %v200_v9 }
   0xa   :  { %1325 = vmatprep.subr.mxu0 %v70_v5  ;;  %1366 = vmatpush3.msra.mxu1 %v200_v9 }
   0xb   :  { %1326 = vmatpush3.msra.mxu0 %v70_v5  ;;  %1367 = vmatprep.subr.mxu1 %v199_v11 }
   0xc   :  { %1327 = vmatprep.subr.mxu0 %v69_v8 }
   0xd   :  { %1328 = vmatpush3.msra.mxu0 %v69_v8 }
   0xe   :  { %1329 = vmatprep.subr.mxu0 %v68_v10 }
   0xf   :  { %20 = vsyncpa [#allocation3], 0  ;;  %1330 = vmatpush3.msra.mxu0 %v68_v10  ;;  %v66_v14 = vld [vmem:[%s2299_s1 + $0x38] sm:$0xff]  ;;  %1368 = vmatpush3.msra.mxu1 %v199_v11  ;;  %v197_v15 = vld [vmem:[%s2301_s3 + $0x50] sm:$0xff]  ;;  %v1534_v40 = vmov 0.0   ;;  %vm1535_vm0 = vmmov 0  }
  0x10   :  { %1331 = vmatprep.subr.mxu0 %v67_v12  ;;  %1369 = vmatprep.subr.mxu1 %v198_v13  ;;  %v65_v16 = vld [vmem:[%s2299_s1 + $0x30] sm:$0xff]  ;;  %v196_v17 = vld [vmem:[%s2301_s3 + $0x48] sm:$0xff]  ;;  %v195_v19 = vld [vmem:[%s2301_s3 + $0x40] sm:$0xff]  ;;  %vm466_vm1 = vcmask 1041409   ;;  %vm468_vm2 = vcmask 1042434   ;;  %vm470_vm3 = vcmask 1043459  }
  0x11   :  { %1332 = vmatpush3.msra.mxu0 %v67_v12  ;;  %1370 = vmatpush3.msra.mxu1 %v198_v13  ;;  %v64_v18 = vld [vmem:[%s2299_s1 + $0x28] sm:$0xff]  ;;  %v63_v20 = vld [vmem:[%s2299_s1 + $0x20] sm:$0xff]  ;;  %v194_v21 = vld [vmem:[%s2301_s3 + $0x38] sm:$0xff]  ;;  %vm543_vm4 = vcmask 1043456   ;;  %s1536_s25 = smov [#allocation2]  }
  0x12   :  { %1333 = vmatprep.subr.mxu0 %v66_v14  ;;  %1371 = vmatprep.subr.mxu1 %v197_v15  ;;  %v62_v22 = vld [vmem:[%s2299_s1 + $0x18] sm:$0xff]  ;;  %v193_v23 = vld [vmem:[%s2301_s3 + $0x30] sm:$0xff]  ;;  %v192_v25 = vld [vmem:[%s2301_s3 + $0x28] sm:$0xff]  ;;  %s1150_s26 = sshll.u32 %s1536_s25, 4  ;;  %s1151_s26 = int_to_ptr.vmem [resolvable:$true] %s1150_s26 }
  0x13   :  { %1334 = vmatpush3.msra.mxu0 %v66_v14  ;;  %1372 = vmatpush3.msra.mxu1 %v197_v15  ;;  %v61_v24 = vld [vmem:[%s2299_s1 + $0x10] sm:$0xff]  ;;  %v60_v26 = vld [vmem:[%s2299_s1 + $0x8] sm:$0xff]  ;;  %v191_v27 = vld [vmem:[%s2301_s3 + $0x20] sm:$0xff]  ;;  %p1517_p1 = scmp.lt.s32.totalorder %s1151_s26, %s1151_s26 }
  0x14   :  { %1335 = vmatprep.subr.mxu0 %v65_v16  ;;  %1373 = vmatprep.subr.mxu1 %v196_v17  ;;  %v59_v28 = vld [vmem:[%s2299_s1] sm:$0xff]  ;;  %v190_v29 = vld [vmem:[%s2301_s3 + $0x18] sm:$0xff]  ;;  %v52_v30 = vld [vmem:[%s2298_s0 + $0x8] sm:$0xff] }
  0x15   :  { %1336 = vmatpush3.msra.mxu0 %v65_v16  ;;  %1374 = vmatpush3.msra.mxu1 %v196_v17  ;;  %v189_v31 = vld [vmem:[%s2301_s3 + $0x10] sm:$0xff]  ;;  %v188_v33 = vld [vmem:[%s2301_s3 + $0x8] sm:$0xff]  ;;  %v54_v34 = vld [vmem:[%s2298_s0 + $0x18] sm:$0xff] }
  0x16   :  { %1337 = vmatprep.subr.mxu0 %v64_v18  ;;  %1375 = vmatprep.subr.mxu1 %v195_v19  ;;  %v53_v32 = vld [vmem:[%s2298_s0 + $0x10] sm:$0xff]  ;;  %v187_v35 = vld [vmem:[%s2301_s3] sm:$0xff]  ;;  %v56_v37 = vld [vmem:[%s2298_s0 + $0x28] sm:$0xff] }
  0x17   :  { %1338 = vmatpush3.msra.mxu0 %v64_v18  ;;  %1376 = vmatpush3.msra.mxu1 %v195_v19  ;;  %v55_v36 = vld [vmem:[%s2298_s0 + $0x20] sm:$0xff]  ;;  %v57_v38 = vld [vmem:[%s2298_s0 + $0x30] sm:$0xff]  ;;  %v58_v39 = vld [vmem:[%s2298_s0 + $0x38] sm:$0xff] }
  0x18   :  { %1339 = vmatprep.subr.mxu0 %v63_v20  ;;  %1377 = vmatprep.subr.mxu1 %v194_v21  ;;  %v454_v41 = vld [vmem:[%s2303_s5 + $0x78] sm:$0xff]  ;;  %v453_v42 = vld [vmem:[%s2303_s5 + $0x70] sm:$0xff]  ;;  %v452_v43 = vld [vmem:[%s2303_s5 + $0x68] sm:$0xff] }
  0x19   :  { %1340 = vmatpush3.msra.mxu0 %v63_v20  ;;  %1378 = vmatpush3.msra.mxu1 %v194_v21  ;;  %v451_v44 = vld [vmem:[%s2303_s5 + $0x60] sm:$0xff]  ;;  %v450_v45 = vld [vmem:[%s2303_s5 + $0x58] sm:$0xff]  ;;  %v449_v46 = vld [vmem:[%s2303_s5 + $0x50] sm:$0xff] }
  0x1a   :  { %1341 = vmatprep.subr.mxu0 %v62_v22  ;;  %1379 = vmatprep.subr.mxu1 %v193_v23  ;;  %v448_v47 = vld [vmem:[%s2303_s5 + $0x48] sm:$0xff]  ;;  %v447_v48 = vld [vmem:[%s2303_s5 + $0x40] sm:$0xff]  ;;  %v446_v49 = vld [vmem:[%s2303_s5 + $0x38] sm:$0xff] }
  0x1b   :  { %1342 = vmatpush3.msra.mxu0 %v62_v22  ;;  %1380 = vmatpush3.msra.mxu1 %v193_v23  ;;  %v445_v50 = vld [vmem:[%s2303_s5 + $0x30] sm:$0xff]  ;;  %v444_v51 = vld [vmem:[%s2303_s5 + $0x28] sm:$0xff]  ;;  %v443_v52 = vld [vmem:[%s2303_s5 + $0x20] sm:$0xff] }
  0x1c   :  { %1343 = vmatprep.subr.mxu0 %v61_v24  ;;  %1381 = vmatprep.subr.mxu1 %v192_v25  ;;  %v442_v53 = vld [vmem:[%s2303_s5 + $0x18] sm:$0xff]  ;;  %v441_v54 = vld [vmem:[%s2303_s5 + $0x10] sm:$0xff]  ;;  %v440_v55 = vld [vmem:[%s2303_s5 + $0x8] sm:$0xff] }
  0x1d   :  { %1344 = vmatpush3.msra.mxu0 %v61_v24  ;;  %1382 = vmatpush3.msra.mxu1 %v192_v25  ;;  %v439_v56 = vld [vmem:[%s2303_s5] sm:$0xff] }
  0x1e   :  { %1345 = vmatprep.subr.mxu0 %v60_v26  ;;  %1383 = vmatprep.subr.mxu1 %v191_v27  ;;  %v1158_v58 = vld [vmem:[%s2300_s2] ss:$0 sm:$0xff] }
  0x1f   :  { %1346 = vmatpush3.msra.mxu0 %v60_v26  ;;  %1384 = vmatpush3.msra.mxu1 %v191_v27 }
  0x20   :  { %1347 = vmatprep.subr.mxu0 %v59_v28  ;;  %1385 = vmatprep.subr.mxu1 %v190_v29 }
  0x21   :  { %1348 = vmatpush3.msra.mxu0 %v59_v28  ;;  %1386 = vmatpush3.msra.mxu1 %v190_v29 }
  0x22   :  { %1350 = vmatmul.mubr.f32.vlgmr.msra.gmra.mxu0 %v52_v30  ;;  %1387 = vmatprep.subr.mxu1 %v189_v31 }
  0x23   :  { %1352 = vmatprep.mubr.f32.mxu0 %v53_v32  ;;  %1388 = vmatpush3.msra.mxu1 %v189_v31 }
  0x24   :  { %1389 = vmatprep.subr.mxu1 %v188_v33  ;;  %1393 = vmatprep.mubr.f32.mxu1 %v1632_v4 }
  0x25   :  { %1390 = vmatpush3.msra.mxu1 %v188_v33  ;;  %1405 = vmatprep.subr.mxu0 %v1534_v40 }
  0x26   :  { %1353 = vmatmul.mubr.f32.gmra.mxu0 %v54_v34  ;;  %1391 = vmatprep.subr.mxu1 %v187_v35 }
  0x27   :  { %1355 = vmatprep.mubr.f32.mxu0 %v55_v36  ;;  %1392 = vmatpush3.msra.mxu1 %v187_v35 }
  0x28   :  { %1394 = vmatmul.mubr.f32.vlgmr.msra.gmra.mxu1 %v52_v30  ;;  %1406 = vmatpush3.msra.mxu0 %v454_v41 }
  0x29   :  { %1396 = vmatprep.mubr.f32.mxu1 %v53_v32  ;;  %1407 = vmatprep.subr.mxu0 %v1534_v40 }
  0x2a   :  { %1356 = vmatmul.mubr.f32.gmra.mxu0 %v56_v37 }
  0x2b   :  { %1358 = vmatprep.mubr.f32.mxu0 %v57_v38  ;;  %1408 = vmatpush3.msra.mxu0 %v453_v42 }
  0x2c   :  { %1397 = vmatmul.mubr.f32.gmra.mxu1 %v54_v34  ;;  %1409 = vmatprep.subr.mxu0 %v1534_v40 }
  0x2d   :  { %1399 = vmatprep.mubr.f32.mxu1 %v55_v36  ;;  %1410 = vmatpush3.msra.mxu0 %v452_v43 }
  0x2e   :  { %1359 = vmatmul.mubr.f32.gmra.mxu0 %v58_v39  ;;  %1411 = vmatprep.subr.mxu0 %v1534_v40 }
  0x2f   :  { %1412 = vmatpush3.msra.mxu0 %v451_v44  ;;  %1437 = vmatprep.mubr.msk.f32.mxu0 %vm1535_vm0, %v1534_v40 }
  0x30   :  { %1400 = vmatmul.mubr.f32.gmra.mxu1 %v56_v37  ;;  %1413 = vmatprep.subr.mxu0 %v1534_v40 }
  0x31   :  { %1402 = vmatprep.mubr.f32.mxu1 %v57_v38  ;;  %1414 = vmatpush3.msra.mxu0 %v450_v45 }
  0x32   :  { %1415 = vmatprep.subr.mxu0 %v1534_v40 }
  0x33   :  { %1416 = vmatpush3.msra.mxu0 %v449_v46 }
  0x34   :  { %1403 = vmatmul.mubr.f32.gmra.mxu1 %v58_v39  ;;  %1417 = vmatprep.subr.mxu0 %v1534_v40 }
  0x35   :  { %724 = vmatprep.mubr.f32.mxu1 %v1534_v40  ;;  %1418 = vmatpush3.msra.mxu0 %v448_v47 }
  0x36   :  { %1419 = vmatprep.subr.mxu0 %v1534_v40 }
  0x37   :  { %1420 = vmatpush3.msra.mxu0 %v447_v48 }
  0x38   :  { %1421 = vmatprep.subr.mxu0 %v1534_v40 }
  0x39   :  { %1422 = vmatpush3.msra.mxu0 %v446_v49 }
  0x3a   :  { %1423 = vmatprep.subr.mxu0 %v1534_v40 }
  0x3b   :  { %1424 = vmatpush3.msra.mxu0 %v445_v50 }
  0x3c   :  { %1425 = vmatprep.subr.mxu0 %v1534_v40 }
  0x3d   :  { %1426 = vmatpush3.msra.mxu0 %v444_v51 }
  0x3e   :  { %1427 = vmatprep.subr.mxu0 %v1534_v40 }
  0x3f   :  { %1428 = vmatpush3.msra.mxu0 %v443_v52 }
  0x40   :  { %1429 = vmatprep.subr.mxu0 %v1534_v40 }
  0x41   :  { %1430 = vmatpush3.msra.mxu0 %v442_v53 }
  0x42   :  { %1431 = vmatprep.subr.mxu0 %v1534_v40 }
  0x43   :  { %1432 = vmatpush3.msra.mxu0 %v441_v54 }
  0x44   :  { %1433 = vmatprep.subr.mxu0 %v1534_v40 }
  0x45   :  { %1434 = vmatpush3.msra.mxu0 %v440_v55 }
  0x46   :  { %1435 = vmatprep.subr.mxu0 %v1534_v40 }
  0x47   :  { %1436 = vmatpush3.msra.mxu0 %v439_v56 }
  0xe2   :  { %v1351_v57 = vpop.f32.mrf.mxu0 }
  0xe3   :  { %v154_v60 = vadd.f32 %v1351_v57, %v1158_v58 }
  0xe4   :  { %v148_v59 = vpop.f32.mrf.mxu0 }
  0xe5   :  { %v149_v61 = vadd.f32 %v1158_v58, %v148_v59 }
  0xe6   :  { %v1354_v62 = vpop.f32.mrf.mxu0 }
  0xe7   :  { %v315_v63 = vmax.f32 %v149_v61, %v154_v60  ;;  %v164_v2 = vadd.f32 %v1354_v62, %v1158_v58 }
  0xe8   :  { %v158_v0 = vpop.f32.mrf.mxu0  ;;  %v1395_v26 = vpop.f32.mrf.mxu1 }
  0xe9   :  { %v316_v1 = vrot.slane %v315_v63, 4  ;;  %v159_v3 = vadd.f32 %v1158_v58, %v158_v0 }
  0xea   :  { %v1357_v4 = vpop.f32.mrf.mxu0  ;;  %v276_v37 = vpop.f32.mrf.mxu1 }
  0xeb   :  { %v317_v5 = vmax.f32 %v315_v63, %v316_v1  ;;  %v322_v6 = vmax.f32 %v159_v3, %v164_v2  ;;  %v174_v10 = vadd.f32 %v1357_v4, %v1158_v58 }
  0xec   :  { %v168_v7 = vpop.f32.mrf.mxu0  ;;  %v1398_v47 = vpop.f32.mrf.mxu1 }
  0xed   :  { %v318_v8 = vrot.slane %v317_v5, 2  ;;  %v323_v9 = vrot.slane %v322_v6, 4  ;;  %v169_v11 = vadd.f32 %v1158_v58, %v168_v7 }
  0xee   :  { %v1360_v12 = vpop.f32.mrf.mxu0  ;;  %v286_v54 = vpop.f32.mrf.mxu1 }
  0xef   :  { %v319_v13 = vmax.f32 %v317_v5, %v318_v8  ;;  %v324_v14 = vmax.f32 %v322_v6, %v323_v9  ;;  %v329_v15 = vmax.f32 %v169_v11, %v174_v10  ;;  %v184_v16 = vadd.f32 %v1360_v12, %v1158_v58 }
  0xf0   :  { %v178_v17 = vpop.f32.mrf.mxu0  ;;  %v1401_v59 = vpop.f32.mrf.mxu1 }
  0xf1   :  { %v320_v18 = vrot.slane %v319_v13, 1  ;;  %v325_v19 = vrot.slane %v324_v14, 2  ;;  %v330_v20 = vrot.slane %v329_v15, 4  ;;  %v179_v21 = vadd.f32 %v1158_v58, %v178_v17 }
  0xf2   :  { %v296_v63 = vpop.f32.mrf.mxu1 }
  0xf3   :  { %v321_v22 = vmax.f32 %v319_v13, %v320_v18  ;;  %v326_v23 = vmax.f32 %v324_v14, %v325_v19  ;;  %v331_v24 = vmax.f32 %v329_v15, %v330_v20  ;;  %v336_v25 = vmax.f32 %v179_v21, %v184_v16 }
  0xf4   :  { %v1404_v9 = vpop.f32.mrf.mxu1 }
  0xf5   :  { %v343_v27 = vsub.f32 %v149_v61, %v321_v22  ;;  %v344_v28 = vsub.f32 %v154_v60, %v321_v22  ;;  %v327_v29 = vrot.slane %v326_v23, 1  ;;  %v332_v30 = vrot.slane %v331_v24, 2 }
  0xf6   :  { %v337_v31 = vrot.slane %v336_v25, 4  ;;  %v306_v22 = vpop.f32.mrf.mxu1 }
  0xf7   :  { %v351_v32 = vmul.f32 1.442695, %v343_v27  ;;  %v353_v33 = vmul.f32 1.442695, %v344_v28  ;;  %v328_v34 = vmax.f32 %v326_v23, %v327_v29  ;;  %v333_v35 = vmax.f32 %v331_v24, %v332_v30 }
  0xf8   :  { %v338_v36 = vmax.f32 %v336_v25, %v337_v31 }
  0xf9   :  { %1478 = vpow2.f32 %v351_v32  ;;  %v345_v38 = vsub.f32 %v159_v3, %v328_v34  ;;  %v346_v39 = vsub.f32 %v164_v2, %v328_v34  ;;  %v334_v41 = vrot.slane %v333_v35, 1  ;;  %v1159_v2 = vld [vmem:[%s2302_s4] ss:$0 sm:$0xff] }
  0xfa   :  { %1480 = vpow2.f32 %v353_v33  ;;  %v339_v42 = vrot.slane %v338_v36, 2  ;;  %v292_v4 = vadd.f32 %v1398_v47, %v1159_v2  ;;  %v287_v5 = vadd.f32 %v1159_v2, %v286_v54 }
  0xfb   :  { %v355_v43 = vmul.f32 1.442695, %v345_v38  ;;  %v357_v44 = vmul.f32 1.442695, %v346_v39  ;;  %v335_v45 = vmax.f32 %v333_v35, %v334_v41  ;;  %v297_v8 = vadd.f32 %v1159_v2, %v296_v63 }
  0xfc   :  { %v340_v46 = vmax.f32 %v338_v36, %v339_v42  ;;  %v302_v12 = vadd.f32 %v1401_v59, %v1159_v2  ;;  %v312_v27 = vadd.f32 %v1404_v9, %v1159_v2  ;;  %v307_v32 = vadd.f32 %v1159_v2, %v306_v22 }
  0xfd   :  { %1482 = vpow2.f32 %v355_v43  ;;  %v347_v48 = vsub.f32 %v169_v11, %v335_v45  ;;  %v348_v49 = vsub.f32 %v174_v10, %v335_v45  ;;  %v282_v10 = vadd.f32 %v1395_v26, %v1159_v2 }
  0xfe   :  { %1484 = vpow2.f32 %v357_v44  ;;  %v341_v50 = vrot.slane %v340_v46, 1  ;;  %v277_v11 = vadd.f32 %v1159_v2, %v276_v37 }
  0xff   :  { %v359_v51 = vmul.f32 1.442695, %v347_v48  ;;  %v361_v52 = vmul.f32 1.442695, %v348_v49 }
 0x100   :  { %v342_v53 = vmax.f32 %v340_v46, %v341_v50 }
 0x101   :  { %1486 = vpow2.f32 %v359_v51 }
 0x102   :  { %1488 = vpow2.f32 %v361_v52  ;;  %v349_v55 = vsub.f32 %v179_v21, %v342_v53  ;;  %v350_v56 = vsub.f32 %v184_v16, %v342_v53 }
 0x104   :  { %v363_v57 = vmul.f32 1.442695, %v349_v55  ;;  %v365_v58 = vmul.f32 1.442695, %v350_v56 }
 0x106   :  { %v1479_v60 = vpop.eup %1478  ;;  %1490 = vpow2.f32 %v363_v57 }
 0x107   :  { %v1481_v61 = vpop.eup %1480  ;;  %1492 = vpow2.f32 %v365_v58  ;;  %v367_v24 = vmul.f32 %v1479_v60, %v277_v11 }
 0x108   :  { %v403_v62 = vadd.f32 %v1481_v61, %v1479_v60  ;;  %v368_v23 = vmul.f32 %v1481_v61, %v282_v10 }
 0x10a   :  { %v1483_v0 = vpop.eup %1482  ;;  %v404_v1 = vrot.slane %v403_v62, 4  ;;  %v375_v38 = vadd.f32 %v368_v23, %v367_v24 }
 0x10b   :  { %v1485_v3 = vpop.eup %1484  ;;  %v369_v18 = vmul.f32 %v1483_v0, %v287_v5 }
 0x10c   :  { %v405_v6 = vadd.f32 %v404_v1, %v403_v62  ;;  %v410_v7 = vadd.f32 %v1485_v3, %v1483_v0  ;;  %v370_v17 = vmul.f32 %v1485_v3, %v292_v4  ;;  %v376_v51 = vrot.slane %v375_v38, 4 }
 0x10e   :  { %v1487_v13 = vpop.eup %1486  ;;  %v411_v14 = vrot.slane %v410_v7, 4  ;;  %v406_v16 = vrot.slane %v405_v6, 2  ;;  %v382_v31 = vadd.f32 %v370_v17, %v369_v18  ;;  %v377_v61 = vadd.f32 %v376_v51, %v375_v38  ;;  %v633_v38 = vld [vmem:[%s2307_s9 + $0x1d8] sm:$0xff] }
 0x10f   :  { %v1489_v15 = vpop.eup %1488  ;;  %v371_v21 = vmul.f32 %v1487_v13, %v297_v8 }
 0x110   :  { %v412_v19 = vadd.f32 %v411_v14, %v410_v7  ;;  %v417_v20 = vadd.f32 %v1489_v15, %v1487_v13  ;;  %v372_v25 = vmul.f32 %v1489_v15, %v302_v12  ;;  %v407_v26 = vadd.f32 %v406_v16, %v405_v6 }
 0x111   :  { %v383_v45 = vrot.slane %v382_v31, 4  ;;  %v378_v3 = vrot.slane %v377_v61, 2 }
 0x112   :  { %v413_v28 = vrot.slane %v412_v19, 2  ;;  %v418_v29 = vrot.slane %v417_v20, 4  ;;  %v389_v36 = vadd.f32 %v372_v25, %v371_v21  ;;  %v408_v43 = vrot.slane %v407_v26, 1 }
 0x113   :  { %v1491_v30 = vpop.eup %1490  ;;  %v384_v56 = vadd.f32 %v383_v45, %v382_v31  ;;  %v379_v7 = vadd.f32 %v378_v3, %v377_v61  ;;  %v628_v45 = vld [vmem:[%s2307_s9 + $0x1b0] sm:$0xff]  ;;  %v614_v61 = vld [vmem:[%s2307_s9 + $0x140] sm:$0xff]  ;;  %v607_v3 = vld [vmem:[%s2307_s9 + $0x108] sm:$0xff] }
 0x114   :  { %v1493_v33 = vpop.eup %1492  ;;  %v414_v34 = vadd.f32 %v413_v28, %v412_v19  ;;  %v419_v35 = vadd.f32 %v418_v29, %v417_v20  ;;  %v373_v46 = vmul.f32 %v1491_v30, %v307_v32  ;;  %v390_v48 = vrot.slane %v389_v36, 4  ;;  %v1160_v29 = vld [vmem:[%s2304_s6] ss:$0 sm:$0xff] }
 0x115   :  { %v424_v37 = vadd.f32 %v1493_v33, %v1491_v30  ;;  %v374_v39 = vmul.f32 %v1493_v33, %v312_v27  ;;  %v409_v54 = vadd.f32 %v408_v43, %v407_v26  ;;  %v385_v63 = vrot.slane %v384_v56, 2  ;;  %v635_v33 = vld [vmem:[%s2307_s9 + $0x1e8] sm:$0xff]  ;;  %v629_v43 = vld [vmem:[%s2307_s9 + $0x1b8] sm:$0xff] }
 0x116   :  { %v415_v41 = vrot.slane %v414_v34, 1  ;;  %v420_v42 = vrot.slane %v419_v35, 2  ;;  %v391_v59 = vadd.f32 %v390_v48, %v389_v36  ;;  %v380_v11 = vrot.slane %v379_v7, 1  ;;  %660 = vmatprep.subr.mxu1 %v635_v33  ;;  %v636_v36 = vld [vmem:[%s2307_s9 + $0x1f0] sm:$0xff]  ;;  %v622_v48 = vld [vmem:[%s2307_s9 + $0x180] sm:$0xff]  ;;  %v581_v33 = vld [vmem:[%s2307_s9 + $0x38] sm:$0xff] }
 0x117   :  { %v425_v44 = vrot.slane %v424_v37, 4  ;;  %v396_v52 = vadd.f32 %v374_v39, %v373_v46  ;;  %v386_v4 = vadd.f32 %v385_v63, %v384_v56  ;;  %v630_v39 = vld [vmem:[%s2307_s9 + $0x1c0] sm:$0xff]  ;;  %v623_v46 = vld [vmem:[%s2307_s9 + $0x188] sm:$0xff]  ;;  %v621_v56 = vld [vmem:[%s2307_s9 + $0x178] sm:$0xff] }
 0x118   :  { %v421_v47 = vadd.f32 %v420_v42, %v419_v35  ;;  %v416_v49 = vadd.f32 %v415_v41, %v414_v34  ;;  %v392_v1 = vrot.slane %v391_v59, 2  ;;  %v381_v18 = vadd.f32 %v380_v11, %v379_v7  ;;  %v637_v34 = vld [vmem:[%s2307_s9 + $0x1f8] sm:$0xff]  ;;  %v634_v35 = vld [vmem:[%s2307_s9 + $0x1e0] sm:$0xff]  ;;  %v632_v41 = vld [vmem:[%s2307_s9 + $0x1d0] sm:$0xff] }
 0x119   :  { %v426_v50 = vadd.f32 %v425_v44, %v424_v37  ;;  %v397_v57 = vrot.slane %v396_v52, 4  ;;  %v387_v8 = vrot.slane %v386_v4, 1  ;;  %731 = vmatprep.subr.mxu0 %v637_v34  ;;  %v631_v37 = vld [vmem:[%s2307_s9 + $0x1c8] sm:$0xff]  ;;  %661 = vmatpush1.msra.mxu1 %v634_v35  ;;  %v626_v44 = vld [vmem:[%s2307_s9 + $0x1a0] sm:$0xff]  ;;  %v580_v35 = vld [vmem:[%s2307_s9 + $0x30] sm:$0xff] }
 0x11a   :  { %v422_v53 = vrot.slane %v421_v47, 1  ;;  %1494 = vrcp.f32 %v416_v49  ;;  %v393_v6 = vadd.f32 %v392_v1, %v391_v59  ;;  %v627_v42 = vld [vmem:[%s2307_s9 + $0x1a8] sm:$0xff]  ;;  %662 = vmatprep.subr.mxu1 %v631_v37  ;;  %v624_v49 = vld [vmem:[%s2307_s9 + $0x190] sm:$0xff]  ;;  %v610_v1 = vld [vmem:[%s2307_s9 + $0x120] sm:$0xff] }
 0x11b   :  { %v427_v55 = vrot.slane %v426_v50, 2  ;;  %v398_v0 = vadd.f32 %v397_v57, %v396_v52  ;;  %v388_v14 = vadd.f32 %v387_v8, %v386_v4  ;;  %663 = vmatpush1.msra.mxu1 %v630_v39  ;;  %v618_v57 = vld [vmem:[%s2307_s9 + $0x160] sm:$0xff]  ;;  %v615_v59 = vld [vmem:[%s2307_s9 + $0x148] sm:$0xff]  ;;  %v609_v4 = vld [vmem:[%s2307_s9 + $0x118] sm:$0xff] }
 0x11c   :  { %v423_v58 = vadd.f32 %v422_v53, %v421_v47  ;;  %v394_v10 = vrot.slane %v393_v6, 1  ;;  %v625_v47 = vld [vmem:[%s2307_s9 + $0x198] sm:$0xff]  ;;  %664 = vmatprep.subr.mxu1 %v627_v42  ;;  %v611_v63 = vld [vmem:[%s2307_s9 + $0x128] sm:$0xff]  ;;  %v578_v34 = vld [vmem:[%s2307_s9 + $0x20] sm:$0xff] }
 0x11d   :  { %v428_v60 = vadd.f32 %v427_v55, %v426_v50  ;;  %v399_v5 = vrot.slane %v398_v0, 2  ;;  %665 = vmatpush1.msra.mxu1 %v626_v44  ;;  %v619_v55 = vld [vmem:[%s2307_s9 + $0x168] sm:$0xff]  ;;  %v605_v8 = vld [vmem:[%s2307_s9 + $0xf8] sm:$0xff]  ;;  %v576_v39 = vld [vmem:[%s2307_s9 + $0x10] sm:$0xff] }
 0x11e   :  { %1496 = vrcp.f32 %v423_v58  ;;  %v395_v17 = vadd.f32 %v394_v10, %v393_v6  ;;  %666 = vmatprep.subr.mxu1 %v623_v46  ;;  %v620_v58 = vld [vmem:[%s2307_s9 + $0x170] sm:$0xff]  ;;  %v603_v7 = vld [vmem:[%s2307_s9 + $0xe8] sm:$0xff]  ;;  %v577_v37 = vld [vmem:[%s2307_s9 + $0x18] sm:$0xff] }
 0x11f   :  { %1498 = vrcp.f32 %v409_v54  ;;  %v429_v62 = vrot.slane %v428_v60, 1  ;;  %v400_v9 = vadd.f32 %v399_v5, %v398_v0  ;;  %667 = vmatpush1.msra.mxu1 %v622_v48  ;;  %v613_v0 = vld [vmem:[%s2307_s9 + $0x138] sm:$0xff]  ;;  %v606_v5 = vld [vmem:[%s2307_s9 + $0x100] sm:$0xff]  ;;  %v608_v6 = vld [vmem:[%s2307_s9 + $0x110] sm:$0xff] }
 0x120   :  { %668 = vmatprep.subr.mxu1 %v619_v55  ;;  %v604_v10 = vld [vmem:[%s2307_s9 + $0xf0] sm:$0xff]  ;;  %v599_v11 = vld [vmem:[%s2307_s9 + $0xc8] sm:$0xff] }
 0x121   :  { %v430_v2 = vadd.f32 %v429_v62, %v428_v60  ;;  %v401_v15 = vrot.slane %v400_v9, 1  ;;  %669 = vmatpush1.msra.mxu1 %v618_v57  ;;  %v617_v60 = vld [vmem:[%s2307_s9 + $0x158] sm:$0xff]  ;;  %v616_v62 = vld [vmem:[%s2307_s9 + $0x150] sm:$0xff] }
 0x122   :  { %670 = vmatprep.subr.mxu1 %v615_v59  ;;  %v900_v55 = vld [vmem:[%s2309_s11 + $0x1f0] sm:$0xff]  ;;  %v899_v59 = vld [vmem:[%s2309_s11 + $0x1e8] sm:$0xff] }
 0x123   :  { %1500 = vrcp.f32 %v430_v2  ;;  %v402_v22 = vadd.f32 %v401_v15, %v400_v9  ;;  %671 = vmatpush1.msra.mxu1 %v614_v61  ;;  %v612_v2 = vld [vmem:[%s2307_s9 + $0x130] sm:$0xff]  ;;  %v602_v9 = vld [vmem:[%s2307_s9 + $0xe0] sm:$0xff]  ;;  %v595_v15 = vld [vmem:[%s2307_s9 + $0xa8] sm:$0xff] }
 0x124   :  { %672 = vmatprep.subr.mxu1 %v611_v63  ;;  %v884_v57 = vld [vmem:[%s2309_s11 + $0x170] sm:$0xff]  ;;  %v883_v61 = vld [vmem:[%s2309_s11 + $0x168] sm:$0xff]  ;;  %v898_v63 = vld [vmem:[%s2309_s11 + $0x1e0] sm:$0xff] }
 0x125   :  { %673 = vmatpush1.msra.mxu1 %v610_v1  ;;  %v882_v1 = vld [vmem:[%s2309_s11 + $0x160] sm:$0xff] }
 0x126   :  { %674 = vmatprep.subr.mxu1 %v607_v3  ;;  %v897_v3 = vld [vmem:[%s2309_s11 + $0x1d8] sm:$0xff] }
 0x127   :  { %v1495_v12 = vpop.eup %1494  ;;  %675 = vmatpush1.msra.mxu1 %v606_v5  ;;  %v881_v5 = vld [vmem:[%s2309_s11 + $0x158] sm:$0xff] }
 0x128   :  { %v436_v19 = vmul.f32 %v1495_v12, %v388_v14  ;;  %676 = vmatprep.subr.mxu1 %v603_v7  ;;  %v601_v12 = vld [vmem:[%s2307_s9 + $0xd8] sm:$0xff]  ;;  %v600_v14 = vld [vmem:[%s2307_s9 + $0xd0] sm:$0xff] }
 0x129   :  { %677 = vmatpush1.msra.mxu1 %v602_v9  ;;  %v896_v7 = vld [vmem:[%s2309_s11 + $0x1d0] sm:$0xff] }
 0x12a   :  { %678 = vmatprep.subr.mxu1 %v599_v11  ;;  %v880_v9 = vld [vmem:[%s2309_s11 + $0x150] sm:$0xff]  ;;  %v895_v11 = vld [vmem:[%s2309_s11 + $0x1c8] sm:$0xff] }
 0x12b   :  { %v1497_v13 = vpop.eup %1496 }
 0x12c   :  { %v1499_v16 = vpop.eup %1498  ;;  %v437_v20 = vmul.f32 %v1497_v13, %v395_v17  ;;  %v598_v13 = vld [vmem:[%s2307_s9 + $0xc0] sm:$0xff] }
 0x12d   :  { %v435_v21 = vmul.f32 %v1499_v16, %v381_v18  ;;  %679 = vmatpush1.msra.mxu1 %v598_v13  ;;  %v597_v16 = vld [vmem:[%s2307_s9 + $0xb8] sm:$0xff]  ;;  %v594_v17 = vld [vmem:[%s2307_s9 + $0xa0] sm:$0xff]  ;;  %v596_v18 = vld [vmem:[%s2307_s9 + $0xb0] sm:$0xff] }
 0x12e   :  { %680 = vmatprep.subr.mxu1 %v595_v15  ;;  %v879_v13 = vld [vmem:[%s2309_s11 + $0x148] sm:$0xff]  ;;  %v894_v15 = vld [vmem:[%s2309_s11 + $0x1c0] sm:$0xff] }
 0x12f   :  { %v467_v25 = vsel %vm466_vm1, %v436_v19, %v435_v21  ;;  %681 = vmatpush1.msra.mxu1 %v594_v17  ;;  %v591_v19 = vld [vmem:[%s2307_s9 + $0x88] sm:$0xff]  ;;  %v590_v21 = vld [vmem:[%s2307_s9 + $0x80] sm:$0xff] }
 0x130   :  { %v1501_v23 = vpop.eup %1500  ;;  %v469_v27 = vsel %vm468_vm2, %v437_v20, %v467_v25  ;;  %v593_v20 = vld [vmem:[%s2307_s9 + $0x98] sm:$0xff]  ;;  %682 = vmatprep.subr.mxu1 %v591_v19  ;;  %v586_v25 = vld [vmem:[%s2307_s9 + $0x60] sm:$0xff] }
 0x131   :  { %v438_v24 = vmul.f32 %v1501_v23, %v402_v22  ;;  %v592_v22 = vld [vmem:[%s2307_s9 + $0x90] sm:$0xff]  ;;  %683 = vmatpush1.msra.mxu1 %v590_v21  ;;  %v587_v23 = vld [vmem:[%s2307_s9 + $0x68] sm:$0xff]  ;;  %v878_v17 = vld [vmem:[%s2309_s11 + $0x140] sm:$0xff] }
 0x132   :  { %684 = vmatprep.subr.mxu1 %v587_v23  ;;  %v893_v19 = vld [vmem:[%s2309_s11 + $0x1b8] sm:$0xff]  ;;  %v892_v23 = vld [vmem:[%s2309_s11 + $0x1b0] sm:$0xff] }
 0x133   :  { %v471_v28 = vsel %vm470_vm3, %v438_v24, %v469_v27  ;;  %v589_v24 = vld [vmem:[%s2307_s9 + $0x78] sm:$0xff]  ;;  %v588_v27 = vld [vmem:[%s2307_s9 + $0x70] sm:$0xff]  ;;  %685 = vmatpush1.msra.mxu1 %v586_v25 }
 0x134   :  { %1438 = vmatmul.mubr.f32.vlgmr.msra.gmra.mxu0 %v471_v28  ;;  %v583_v28 = vld [vmem:[%s2307_s9 + $0x48] sm:$0xff]  ;;  %v877_v21 = vld [vmem:[%s2309_s11 + $0x138] sm:$0xff]  ;;  %v876_v25 = vld [vmem:[%s2309_s11 + $0x130] sm:$0xff] }
 0x135   :  { %795 = vmatprep.mubr.f32.mxu0 %v1534_v40  ;;  %732 = vmatpush1.msra.mxu0 %v636_v36  ;;  %v575_v36 = vld [vmem:[%s2307_s9 + $0x8] sm:$0xff] }
 0x136   :  { %733 = vmatprep.subr.mxu0 %v633_v38  ;;  %686 = vmatprep.subr.mxu1 %v583_v28  ;;  %v574_v38 = vld [vmem:[%s2307_s9] sm:$0xff]  ;;  %v891_v28 = vld [vmem:[%s2309_s11 + $0x1a8] sm:$0xff] }
 0x137   :  { %734 = vmatpush1.msra.mxu0 %v632_v41 }
 0x138   :  { %735 = vmatprep.subr.mxu0 %v629_v43 }
 0x139   :  { %736 = vmatpush1.msra.mxu0 %v628_v45  ;;  %v1161_v45 = vld [vmem:[%s2305_s7] ss:$0 sm:$0xff] }
 0x13a   :  { %737 = vmatprep.subr.mxu0 %v625_v47  ;;  %v1162_v47 = vld [vmem:[%s2306_s8] ss:$0 sm:$0xff] }
 0x13b   :  { %738 = vmatpush1.msra.mxu0 %v624_v49 }
 0x13c   :  { %739 = vmatprep.subr.mxu0 %v621_v56  ;;  %v852_v56 = vld [vmem:[%s2309_s11 + $0x70] sm:$0xff] }
 0x13d   :  { %740 = vmatpush1.msra.mxu0 %v620_v58  ;;  %v867_v58 = vld [vmem:[%s2309_s11 + $0xe8] sm:$0xff] }
 0x13e   :  { %741 = vmatprep.subr.mxu0 %v617_v60  ;;  %v851_v60 = vld [vmem:[%s2309_s11 + $0x68] sm:$0xff] }
 0x13f   :  { %742 = vmatpush1.msra.mxu0 %v616_v62  ;;  %v866_v62 = vld [vmem:[%s2309_s11 + $0xe0] sm:$0xff] }
 0x140   :  { %743 = vmatprep.subr.mxu0 %v613_v0  ;;  %v850_v0 = vld [vmem:[%s2309_s11 + $0x60] sm:$0xff] }
 0x141   :  { %744 = vmatpush1.msra.mxu0 %v612_v2  ;;  %v865_v2 = vld [vmem:[%s2309_s11 + $0xd8] sm:$0xff] }
 0x142   :  { %745 = vmatprep.subr.mxu0 %v609_v4  ;;  %v849_v4 = vld [vmem:[%s2309_s11 + $0x58] sm:$0xff] }
 0x143   :  { %746 = vmatpush1.msra.mxu0 %v608_v6  ;;  %v864_v6 = vld [vmem:[%s2309_s11 + $0xd0] sm:$0xff] }
 0x144   :  { %747 = vmatprep.subr.mxu0 %v605_v8  ;;  %v848_v8 = vld [vmem:[%s2309_s11 + $0x50] sm:$0xff] }
 0x145   :  { %748 = vmatpush1.msra.mxu0 %v604_v10  ;;  %v863_v10 = vld [vmem:[%s2309_s11 + $0xc8] sm:$0xff] }
 0x146   :  { %749 = vmatprep.subr.mxu0 %v601_v12  ;;  %v847_v12 = vld [vmem:[%s2309_s11 + $0x48] sm:$0xff] }
 0x147   :  { %750 = vmatpush1.msra.mxu0 %v600_v14  ;;  %v862_v14 = vld [vmem:[%s2309_s11 + $0xc0] sm:$0xff] }
 0x148   :  { %751 = vmatprep.subr.mxu0 %v597_v16  ;;  %v846_v16 = vld [vmem:[%s2309_s11 + $0x40] sm:$0xff] }
 0x149   :  { %752 = vmatpush1.msra.mxu0 %v596_v18  ;;  %v861_v18 = vld [vmem:[%s2309_s11 + $0xb8] sm:$0xff] }
 0x14a   :  { %753 = vmatprep.subr.mxu0 %v593_v20  ;;  %v845_v20 = vld [vmem:[%s2309_s11 + $0x38] sm:$0xff] }
 0x14b   :  { %754 = vmatpush1.msra.mxu0 %v592_v22  ;;  %v860_v22 = vld [vmem:[%s2309_s11 + $0xb0] sm:$0xff] }
 0x14c   :  { %755 = vmatprep.subr.mxu0 %v589_v24  ;;  %v844_v24 = vld [vmem:[%s2309_s11 + $0x30] sm:$0xff] }
 0x14d   :  { %756 = vmatpush1.msra.mxu0 %v588_v27  ;;  %v859_v27 = vld [vmem:[%s2309_s11 + $0xa8] sm:$0xff] }
 0x1f4   :  { %v539_v30 = vpop.f32.mrf.mxu0 }
 0x1f5   :  { %v1818_v26 = vadd.f32 %v1160_v29, %v539_v30  ;;  %v585_v29 = vld [vmem:[%s2307_s9 + $0x58] sm:$0xff]  ;;  %v582_v30 = vld [vmem:[%s2307_s9 + $0x40] sm:$0xff] }
 0x1f6   :  { %v1439_v31 = vpop.f32.mrf.mxu0  ;;  %757 = vmatprep.subr.mxu0 %v585_v29  ;;  %687 = vmatpush1.msra.mxu1 %v582_v30  ;;  %v843_v29 = vld [vmem:[%s2309_s11 + $0x28] sm:$0xff] }
 0x1f7   :  { %v544_v32 = vsel %vm543_vm4, %v1818_v26, 0.0  ;;  %v584_v31 = vld [vmem:[%s2307_s9 + $0x50] sm:$0xff]  ;;  %v875_v30 = vld [vmem:[%s2309_s11 + $0x128] sm:$0xff] }
 0x1f8   :  { %545 = vadd.xlane.f32.xlu0 %v544_v32  ;;  %v579_v32 = vld [vmem:[%s2307_s9 + $0x28] sm:$0xff]  ;;  %758 = vmatpush1.msra.mxu0 %v584_v31  ;;  %v858_v31 = vld [vmem:[%s2309_s11 + $0xa0] sm:$0xff] }
 0x1f9   :  { %688 = vmatprep.subr.mxu1 %v579_v32  ;;  %759 = vmatprep.subr.mxu0 %v581_v33  ;;  %v890_v32 = vld [vmem:[%s2309_s11 + $0x1a0] sm:$0xff] }
 0x1fa   :  { %689 = vmatpush1.msra.mxu1 %v578_v34  ;;  %760 = vmatpush1.msra.mxu0 %v580_v35  ;;  %v842_v33 = vld [vmem:[%s2309_s11 + $0x20] sm:$0xff]  ;;  %v857_v35 = vld [vmem:[%s2309_s11 + $0x98] sm:$0xff] }
 0x1fb   :  { %690 = vmatprep.subr.mxu1 %v575_v36  ;;  %761 = vmatprep.subr.mxu0 %v577_v37  ;;  %v874_v34 = vld [vmem:[%s2309_s11 + $0x120] sm:$0xff]  ;;  %v889_v36 = vld [vmem:[%s2309_s11 + $0x198] sm:$0xff] }
 0x1fc   :  { %691 = vmatpush1.msra.mxu1 %v574_v38  ;;  %762 = vmatpush1.msra.mxu0 %v576_v39  ;;  %v841_v37 = vld [vmem:[%s2309_s11 + $0x18] sm:$0xff]  ;;  %v856_v39 = vld [vmem:[%s2309_s11 + $0x90] sm:$0xff] }
 0x1fd   :  { %v873_v38 = vld [vmem:[%s2309_s11 + $0x118] sm:$0xff] }
 0x281   :  { %v546_v50 = vpop.xlane.xlu0 %545 }
 0x282   :  { %v548_v51 = vmul.f32 0.0078125, %v546_v50  ;;  %v869_v50 = vld [vmem:[%s2309_s11 + $0xf8] sm:$0xff] }
 0x283   :  { %1230 = vmatprep.subr.mxu1 %v869_v50  ;;  %v838_v50 = vld [vmem:[%s2309_s11] sm:$0xff] }
 0x284   :  { %v1871_v52 = vsub.f32 %v1818_v26, %v548_v51  ;;  %v901_v51 = vld [vmem:[%s2309_s11 + $0x1f8] sm:$0xff] }
 0x285   :  { %1265 = vmatprep.subr.mxu0 %v901_v51  ;;  %v870_v51 = vld [vmem:[%s2309_s11 + $0x100] sm:$0xff] }
 0x286   :  { %v550_v53 = vmul.f32 %v1871_v52, %v1871_v52 }
 0x288   :  { %v551_v54 = vsel %vm543_vm4, %v550_v53, 0.0  ;;  %v885_v53 = vld [vmem:[%s2309_s11 + $0x178] sm:$0xff] }
 0x289   :  { %552 = vadd.xlane.f32.xlu0 %v551_v54  ;;  %v868_v54 = vld [vmem:[%s2309_s11 + $0xf0] sm:$0xff] }
 0x312   :  { %v553_v41 = vpop.xlane.xlu0 %552 }
 0x313   :  { %v554_v42 = vmul.f32 0.0078125, %v553_v41  ;;  %v888_v41 = vld [vmem:[%s2309_s11 + $0x190] sm:$0xff] }
 0x315   :  { %v555_v43 = vadd.f32 1e-05, %v554_v42  ;;  %v840_v42 = vld [vmem:[%s2309_s11 + $0x10] sm:$0xff] }
 0x317   :  { %1502 = vrsqrt.f32 %v555_v43  ;;  %v872_v43 = vld [vmem:[%s2309_s11 + $0x110] sm:$0xff] }
 0x324   :  { %v1503_v44 = vpop.eup %1502 }
 0x325   :  { %v557_v46 = vmul.f32 %v1503_v44, %v1871_v52  ;;  %v853_v52 = vld [vmem:[%s2309_s11 + $0x78] sm:$0xff]  ;;  %v855_v44 = vld [vmem:[%s2309_s11 + $0x88] sm:$0xff] }
 0x327   :  { %v565_v48 = vmul.f32 %v1161_v45, %v557_v46  ;;  %v887_v45 = vld [vmem:[%s2309_s11 + $0x188] sm:$0xff] }
 0x328   :  { %v839_v46 = vld [vmem:[%s2309_s11 + $0x8] sm:$0xff] }
 0x329   :  { %v573_v49 = vadd.f32 %v1162_v47, %v565_v48  ;;  %v871_v47 = vld [vmem:[%s2309_s11 + $0x108] sm:$0xff]  ;;  %v854_v48 = vld [vmem:[%s2309_s11 + $0x80] sm:$0xff] }
 0x32b   :  { %725 = vmatmul.mubr.f32.vlgmr.msra.gmra.mxu1 %v573_v49  ;;  %796 = vmatmul.mubr.f32.vlgmr.msra.gmra.mxu0 %v573_v49  ;;  %v886_v49 = vld [vmem:[%s2309_s11 + $0x180] sm:$0xff] }
 0x32c   :  { %1231 = vmatpush3.msra.mxu1 %v853_v52  ;;  %1266 = vmatpush3.msra.mxu0 %v885_v53  ;;  %v640_v52 = vlaneseq }
 0x32d   :  { %1232 = vmatprep.subr.mxu1 %v868_v54  ;;  %1267 = vmatprep.subr.mxu0 %v900_v55 }
 0x32e   :  { %1233 = vmatpush3.msra.mxu1 %v852_v56  ;;  %1268 = vmatpush3.msra.mxu0 %v884_v57  ;;  %v641_v53 = vshrl.u32 %v640_v52, 7  ;;  %v638_v56 = vld [vmem:[%s2308_s10] sm:$0xf] }
 0x32f   :  { %1234 = vmatprep.subr.mxu1 %v867_v58  ;;  %1269 = vmatprep.subr.mxu0 %v899_v59  ;;  %v1058_v52 = vld [vmem:[%s2311_s13 + $0x40] sm:$0xff] }
 0x330   :  { %1235 = vmatpush3.msra.mxu1 %v851_v60  ;;  %1270 = vmatpush3.msra.mxu0 %v883_v61  ;;  %v642_v54 = vsub.s32 0, %v641_v53  ;;  %v650_v55 = vsub.s32 2, %v641_v53  ;;  %v646_v57 = vsub.s32 1, %v641_v53  ;;  %v654_v58 = vsub.s32 3, %v641_v53  ;;  %v1057_v53 = vld [vmem:[%s2311_s13 + $0x38] sm:$0xff] }
 0x331   :  { %1236 = vmatprep.subr.mxu1 %v866_v62  ;;  %1271 = vmatprep.subr.mxu0 %v898_v63 }
 0x332   :  { %1237 = vmatpush3.msra.mxu1 %v850_v0  ;;  %1272 = vmatpush3.msra.mxu0 %v882_v1  ;;  %v643_v59 = vrot.slane %v638_v56, %v642_v54  ;;  %v651_v60 = vrot.slane %v638_v56, %v650_v55  ;;  %v647_v63 = vrot.slane %v638_v56, %v646_v57  ;;  %v1056_v54 = vld [vmem:[%s2311_s13 + $0x30] sm:$0xff]  ;;  %v1055_v55 = vld [vmem:[%s2311_s13 + $0x28] sm:$0xff]  ;;  %v1053_v57 = vld [vmem:[%s2311_s13 + $0x18] sm:$0xff] }
 0x333   :  { %1238 = vmatprep.subr.mxu1 %v865_v2  ;;  %1273 = vmatprep.subr.mxu0 %v897_v3  ;;  %v655_v0 = vrot.slane %v638_v56, %v654_v58  ;;  %v1054_v56 = vld [vmem:[%s2311_s13 + $0x20] sm:$0xff]  ;;  %v1052_v58 = vld [vmem:[%s2311_s13 + $0x10] sm:$0xff] }
 0x334   :  { %1239 = vmatpush3.msra.mxu1 %v849_v4  ;;  %1274 = vmatpush3.msra.mxu0 %v881_v5 }
 0x335   :  { %1240 = vmatprep.subr.mxu1 %v864_v6  ;;  %1275 = vmatprep.subr.mxu0 %v896_v7 }
 0x336   :  { %1241 = vmatpush3.msra.mxu1 %v848_v8  ;;  %1276 = vmatpush3.msra.mxu0 %v880_v9 }
 0x337   :  { %1242 = vmatprep.subr.mxu1 %v863_v10  ;;  %1277 = vmatprep.subr.mxu0 %v895_v11 }
 0x338   :  { %1243 = vmatpush3.msra.mxu1 %v847_v12  ;;  %1278 = vmatpush3.msra.mxu0 %v879_v13 }
 0x339   :  { %1244 = vmatprep.subr.mxu1 %v862_v14  ;;  %1279 = vmatprep.subr.mxu0 %v894_v15 }
 0x33a   :  { %1245 = vmatpush3.msra.mxu1 %v846_v16  ;;  %1280 = vmatpush3.msra.mxu0 %v878_v17 }
 0x33b   :  { %1246 = vmatprep.subr.mxu1 %v861_v18  ;;  %1281 = vmatprep.subr.mxu0 %v893_v19 }
 0x33c   :  { %1247 = vmatpush3.msra.mxu1 %v845_v20  ;;  %1282 = vmatpush3.msra.mxu0 %v877_v21 }
 0x33d   :  { %1248 = vmatprep.subr.mxu1 %v860_v22  ;;  %1283 = vmatprep.subr.mxu0 %v892_v23 }
 0x33e   :  { %1249 = vmatpush3.msra.mxu1 %v844_v24  ;;  %1284 = vmatpush3.msra.mxu0 %v876_v25 }
 0x33f   :  { %1250 = vmatprep.subr.mxu1 %v859_v27  ;;  %1285 = vmatprep.subr.mxu0 %v891_v28 }
 0x340   :  { %1251 = vmatpush3.msra.mxu1 %v843_v29  ;;  %1286 = vmatpush3.msra.mxu0 %v875_v30 }
 0x341   :  { %1252 = vmatprep.subr.mxu1 %v858_v31  ;;  %1287 = vmatprep.subr.mxu0 %v890_v32 }
 0x342   :  { %1253 = vmatpush3.msra.mxu1 %v842_v33  ;;  %1288 = vmatpush3.msra.mxu0 %v874_v34 }
 0x343   :  { %1254 = vmatprep.subr.mxu1 %v857_v35  ;;  %1289 = vmatprep.subr.mxu0 %v889_v36 }
 0x344   :  { %1255 = vmatpush3.msra.mxu1 %v841_v37  ;;  %1290 = vmatpush3.msra.mxu0 %v873_v38 }
 0x345   :  { %1256 = vmatprep.subr.mxu1 %v856_v39  ;;  %1291 = vmatprep.subr.mxu0 %v888_v41 }
 0x346   :  { %1257 = vmatpush3.msra.mxu1 %v840_v42  ;;  %1292 = vmatpush3.msra.mxu0 %v872_v43 }
 0x347   :  { %1258 = vmatprep.subr.mxu1 %v855_v44  ;;  %1293 = vmatprep.subr.mxu0 %v887_v45  ;;  %v1065_v44 = vld [vmem:[%s2311_s13 + $0x78] sm:$0xff] }
 0x348   :  { %1259 = vmatpush3.msra.mxu1 %v839_v46  ;;  %1294 = vmatpush3.msra.mxu0 %v871_v47  ;;  %v1064_v46 = vld [vmem:[%s2311_s13 + $0x70] sm:$0xff]  ;;  %v1063_v47 = vld [vmem:[%s2311_s13 + $0x68] sm:$0xff] }
 0x349   :  { %1260 = vmatprep.subr.mxu1 %v854_v48  ;;  %1295 = vmatprep.subr.mxu0 %v886_v49  ;;  %v1062_v48 = vld [vmem:[%s2311_s13 + $0x60] sm:$0xff]  ;;  %v1061_v49 = vld [vmem:[%s2311_s13 + $0x58] sm:$0xff] }
 0x34a   :  { %1261 = vmatpush3.msra.mxu1 %v838_v50  ;;  %1296 = vmatpush3.msra.mxu0 %v870_v51  ;;  %v1060_v50 = vld [vmem:[%s2311_s13 + $0x50] sm:$0xff]  ;;  %v1059_v51 = vld [vmem:[%s2311_s13 + $0x48] sm:$0xff] }
 0x34b   :  { %1440 = vmatprep.subr.mxu1 %v1534_v40 }
 0x3eb   :  { %v726_v61 = vpop.f32.mrf.mxu1  ;;  %v797_v62 = vpop.f32.mrf.mxu0 }
 0x3ec   :  { %v727_v1 = vadd.f32 %v726_v61, %v643_v59  ;;  %v798_v2 = vadd.f32 %v797_v62, %v651_v60  ;;  %v1051_v59 = vld [vmem:[%s2311_s13 + $0x8] sm:$0xff]  ;;  %v1050_v60 = vld [vmem:[%s2311_s13] sm:$0xff] }
 0x3ed   :  { %v728_v3 = vpop.f32.mrf.mxu1  ;;  %v799_v4 = vpop.f32.mrf.mxu0 }
 0x3ee   :  { %v806_v5 = vmul.f32 %v727_v1, %v727_v1  ;;  %v808_v6 = vmul.f32 %v798_v2, %v798_v2  ;;  %v729_v7 = vadd.f32 %v728_v3, %v647_v63  ;;  %v800_v8 = vadd.f32 %v799_v4, %v655_v0  ;;  %v1163_v63 = vld [vmem:[%s2310_s12] ss:$0 sm:$0xff]  ;;  %s1512_s12 = scalar_lea.vmem %s1151_s26, 64 }
 0x3ef   :  { %v802_v36 = vmul.f32 0.5, %v727_v1  ;;  %v804_v39 = vmul.f32 0.5, %v798_v2  ;;  %p1513_p0 = scmp.ne.s32.totalorder %s1151_s26, %s1512_s12  ;;  %p1518_p2 = scmp.lt.s32.totalorder %s1512_s12, %s1512_s12 }
 0x3f0   :  { %v810_v9 = vmul.f32 %v806_v5, %v727_v1  ;;  %v812_v10 = vmul.f32 %v808_v6, %v798_v2  ;;  %v807_v11 = vmul.f32 %v729_v7, %v729_v7  ;;  %v809_v12 = vmul.f32 %v800_v8, %v800_v8 }
 0x3f1   :  { %v803_v33 = vmul.f32 0.5, %v729_v7  ;;  %v805_v37 = vmul.f32 0.5, %v800_v8  ;;  %p1519_p3 = por %p1518_p2, %p1517_p1 }
 0x3f2   :  { %v814_v13 = vmul.f32 0.044715, %v810_v9  ;;  %v816_v14 = vmul.f32 0.044715, %v812_v10  ;;  %v811_v15 = vmul.f32 %v807_v11, %v729_v7  ;;  %v813_v16 = vmul.f32 %v809_v12, %v800_v8 }
 0x3f3   :  { %p1520_p4 = pnand %p1519_p3, %p1513_p0 }
 0x3f4   :  { %v818_v17 = vadd.f32 %v814_v13, %v727_v1  ;;  %v820_v18 = vadd.f32 %v816_v14, %v798_v2  ;;  %v815_v19 = vmul.f32 0.044715, %v811_v15  ;;  %v817_v20 = vmul.f32 0.044715, %v813_v16 }
 0x3f6   :  { %v822_v21 = vmul.f32 0.7978846, %v818_v17  ;;  %v824_v22 = vmul.f32 0.7978846, %v820_v18  ;;  %v819_v23 = vadd.f32 %v815_v19, %v729_v7  ;;  %v821_v24 = vadd.f32 %v817_v20, %v800_v8 }
 0x3f8   :  { %1504 = vtanh.f32 %v822_v21  ;;  %v823_v25 = vmul.f32 0.7978846, %v819_v23  ;;  %v825_v27 = vmul.f32 0.7978846, %v821_v24 }
 0x3f9   :  { %1506 = vtanh.f32 %v824_v22 }
 0x3fa   :  { %1508 = vtanh.f32 %v823_v25 }
 0x3fb   :  { %1510 = vtanh.f32 %v825_v27 }
 0x405   :  { %v1505_v28 = vpop.eup %1504 }
 0x406   :  { %v1507_v29 = vpop.eup %1506  ;;  %v830_v31 = vadd.f32 1.0, %v1505_v28 }
 0x407   :  { %v1509_v30 = vpop.eup %1508  ;;  %v832_v35 = vadd.f32 1.0, %v1507_v29 }
 0x408   :  { %v1511_v32 = vpop.eup %1510  ;;  %v831_v34 = vadd.f32 1.0, %v1509_v30  ;;  %v834_v43 = vmul.f32 %v830_v31, %v802_v36 }
 0x409   :  { %v833_v38 = vadd.f32 1.0, %v1511_v32  ;;  %v836_v45 = vmul.f32 %v832_v35, %v804_v39 }
 0x40a   :  { %v835_v41 = vmul.f32 %v831_v34, %v803_v33 }
 0x40b   :  { %v837_v42 = vmul.f32 %v833_v38, %v805_v37 }
 0x40c   :  { %973 = vmatprep.mubr.f32.mxu1 %v835_v41 }
 0x40d   :  { %1043 = vmatprep.mubr.f32.mxu0 %v837_v42  ;;  %974 = vmatmul.mubr.f32.vlgmr.msra.gmra.mxu1 %v834_v43 }
 0x40e   :  { %1044 = vmatmul.mubr.f32.vlgmr.msra.gmra.mxu0 %v836_v45  ;;  %1441 = vmatpush3.msra.mxu1 %v1065_v44 }
 0x40f   :  { %1442 = vmatprep.subr.mxu1 %v1534_v40  ;;  %1472 = vmatprep.mubr.msk.f32.mxu1 %vm1535_vm0, %v1534_v40 }
 0x410   :  { %1443 = vmatpush3.msra.mxu1 %v1064_v46 }
 0x411   :  { %1444 = vmatprep.subr.mxu1 %v1534_v40 }
 0x412   :  { %1445 = vmatpush3.msra.mxu1 %v1063_v47 }
 0x413   :  { %1446 = vmatprep.subr.mxu1 %v1534_v40 }
 0x414   :  { %1447 = vmatpush3.msra.mxu1 %v1062_v48 }
 0x415   :  { %1448 = vmatprep.subr.mxu1 %v1534_v40 }
 0x416   :  { %1449 = vmatpush3.msra.mxu1 %v1061_v49 }
 0x417   :  { %1450 = vmatprep.subr.mxu1 %v1534_v40 }
 0x418   :  { %1451 = vmatpush3.msra.mxu1 %v1060_v50 }
 0x419   :  { %1452 = vmatprep.subr.mxu1 %v1534_v40 }
 0x41a   :  { %1453 = vmatpush3.msra.mxu1 %v1059_v51 }
 0x41b   :  { %1454 = vmatprep.subr.mxu1 %v1534_v40 }
 0x41c   :  { %1455 = vmatpush3.msra.mxu1 %v1058_v52 }
 0x41d   :  { %1456 = vmatprep.subr.mxu1 %v1534_v40 }
 0x41e   :  { %1457 = vmatpush3.msra.mxu1 %v1057_v53 }
 0x41f   :  { %1458 = vmatprep.subr.mxu1 %v1534_v40 }
 0x420   :  { %1459 = vmatpush3.msra.mxu1 %v1056_v54 }
 0x421   :  { %1460 = vmatprep.subr.mxu1 %v1534_v40 }
 0x422   :  { %1461 = vmatpush3.msra.mxu1 %v1055_v55 }
 0x423   :  { %1462 = vmatprep.subr.mxu1 %v1534_v40 }
 0x424   :  { %1463 = vmatpush3.msra.mxu1 %v1054_v56 }
 0x425   :  { %1464 = vmatprep.subr.mxu1 %v1534_v40 }
 0x426   :  { %1465 = vmatpush3.msra.mxu1 %v1053_v57 }
 0x427   :  { %1466 = vmatprep.subr.mxu1 %v1534_v40 }
 0x428   :  { %1467 = vmatpush3.msra.mxu1 %v1052_v58 }
 0x429   :  { %1468 = vmatprep.subr.mxu1 %v1534_v40 }
 0x42a   :  { %1469 = vmatpush3.msra.mxu1 %v1051_v59 }
 0x42b   :  { %1470 = vmatprep.subr.mxu1 %v1534_v40  ;;  %v1164_v40 = vld [vmem:[%s2312_s14] ss:$0 sm:$0xff] }
 0x42c   :  { %1471 = vmatpush3.msra.mxu1 %v1050_v60 }
 0x4cd   :  { %v1262_v61 = vpop.f32.mrf.mxu1 }
 0x4ce   :  { %v1297_v62 = vpop.f32.mrf.mxu0 }
 0x4cf   :  { %v1263_v0 = vpop.f32.mrf.mxu1 }
 0x4d0   :  { %v1264_v1 = vadd.f32 %v1263_v0, %v1262_v61  ;;  %v1298_v2 = vpop.f32.mrf.mxu0 }
 0x4d1   :  { %v1299_v4 = vadd.f32 %v1298_v2, %v1297_v62 }
 0x4d2   :  { %v976_v3 = vadd.f32 %v1264_v1, %v1163_v63 }
 0x4d4   :  { %v1046_v5 = vadd.f32 %v1299_v4, %v976_v3 }
 0x4d6   :  { %v1049_v6 = vadd.f32 %v1046_v5, %v1818_v26 }
 0x4d8   :  { %1473 = vmatmul.mubr.f32.vlgmr.msra.gmra.mxu1 %v1049_v6 }
 0x598   :  { %v1139_v7 = vpop.f32.mrf.mxu1 }
 0x599   :  { %v1140_v8 = vadd.f32 %v1164_v40, %v1139_v7 }
 0x59a   :  { %v1474_v9 = vpop.f32.mrf.mxu1 }
 0x59b   :  { %1143 = vst [vmem:[#allocation2] sm:$0xf] %v1140_v8 }
 0x59c   :  { %1523 = shalt.err (!%p1520_p4)
}
 0x59d   :  { %1153 = dma.vmem_to_hbm [thread:$0]  %s1151_s26, 64, %s2313_s15, [#allocation3]  }
 0x59e   :  { %1532 = dma.done.wait [#allocation3], 64  }
 0x59f   :  { %1533 = vsyncadd [#allocation3], 4294967232 }
 0x5a0   :  { %1157 = vsyncpa [#allocation3], 1 }

</bundles_post_ra>
